<compile_context>
chip_gen: v7x
topology: tpu7x:2x2x1
jax: 0.10.0
libtpu: 0.0.40
codegen_flags: <defaults>
</compile_context>

<pallas_src>
import jax
import jax.numpy as jnp
import numpy as np
from jax.experimental import pallas as pl
from jax.experimental.pallas import tpu as pltpu


def _decoder_kernel(h_ref, c_ref, enc_ref,
                    w1_ref, b1_ref,
                    w2_ref, b2_ref,
                    bns_ref, bnb_ref,
                    wout_ref, bout_ref,
                    out_ref):
    C = h_ref.shape[1]                          # hidden_channels // 2

    h = h_ref[0].astype(jnp.float32)            # (C, T)  pixels on lanes
    c = c_ref[0].astype(jnp.float32)            # (C, T)

    def conv_lstm_step(x_h, c_cur, w_ref, b_ref):
        # At t == 0 the LSTM input equals h_cur, so the concat-conv collapses
        # to a single matmul with the pre-summed weight halves (folded in the
        # wrapper):  cc = (W_x + W_h)^T @ h  + b.
        cc = (jnp.dot(w_ref[...], x_h, preferred_element_type=jnp.float32)
              + b_ref[...])                     # (4C, T)
        cc = jnp.maximum(cc, 0.0)               # F.relu
        # Fused sigmoid over the contiguous i/f/o slab, then sublane slices.
        sig = jax.nn.sigmoid(cc[:3 * C, :])
        i = sig[:C, :]
        f = sig[C:2 * C, :]
        o = sig[2 * C:3 * C, :]
        g = jnp.tanh(cc[3 * C:, :])
        c_next = f * c_cur + i * g
        h_next = o * jnp.tanh(c_next)
        return h_next, c_next

    # Decoder loop body for t == 0 (seq_len == 1): the LSTM input is h itself.
    h1, c1 = conv_lstm_step(h, c, w1_ref, b1_ref)
    h2, _ = conv_lstm_step(h1, c1, w2_ref, b2_ref)

    # BatchNorm2d (eval) folded into per-channel scale/shift, shape (C, 1).
    hbn = h2 * bns_ref[...] + bnb_ref[...]

    # t == 0 residual add of encoder_last_state; dropout is identity in eval.
    hres = hbn + enc_ref[0].astype(jnp.float32)

    # Final 1x1 conv to output_channels: (OUTC, C) @ (C, T) -> lane-dense out.
    out = (jnp.dot(wout_ref[...], hres, preferred_element_type=jnp.float32)
           + bout_ref[...])
    out_ref[0] = out.astype(out_ref.dtype)


def _choose_pixel_tile(HW, cap=2048):
    """Largest multiple-of-128 tile that divides H*W (capped), else full H*W."""
    if HW % 128 != 0 or HW <= 128:
        return HW                               # full-extent block is always legal
    t = (min(HW, cap) // 128) * 128
    while t >= 128:
        if HW % t == 0:
            return t
        t -= 128
    return HW


def conv_decoder_forward(encoder_last_state, h, c, params, *,
                         stream_dtype=jnp.float32, pixel_tile_cap=2048):
    """encoder_last_state / h / c: NCHW float32 arrays of shape (N, C, H, W)."""
    N, C, H, W = h.shape
    HW = H * W

    # NCHW -> (N, C, H*W): pure reshape, no HBM transpose on either side.
    h_r = h.reshape(N, C, HW).astype(stream_dtype)
    c_r = c.reshape(N, C, HW).astype(stream_dtype)
    enc_r = encoder_last_state.reshape(N, C, HW).astype(stream_dtype)

    (w1, b1, w2, b2, bn_scale, bn_shift, wout, bout) = params
    OUTC = wout.shape[1]

    # Fold the x-half and h-half of each concat-conv weight (valid at t==0,
    # x == h), and transpose everything into the channel-major kernel layout.
    w1_t = (w1[:C, :] + w1[C:, :]).T            # (4C, C)
    w2_t = (w2[:C, :] + w2[C:, :]).T            # (4C, C)
    b1_t = b1.reshape(-1, 1)                    # (4C, 1)
    b2_t = b2.reshape(-1, 1)                    # (4C, 1)
    bns_t = bn_scale.reshape(-1, 1)             # (C, 1)
    bnb_t = bn_shift.reshape(-1, 1)             # (C, 1)
    wout_t = wout.T                             # (OUTC, C)
    bout_t = bout.reshape(-1, 1)                # (OUTC, 1)

    T = _choose_pixel_tile(HW, cap=pixel_tile_cap)
    grid = (N, HW // T)                         # batch axis keeps >=2 parallel
                                                # steps for v7x's two TCs

    act_spec = pl.BlockSpec((1, C, T), lambda n, j: (n, 0, j))
    full = lambda a: pl.BlockSpec(a.shape, lambda n, j: (0, 0))

    out_cm = pl.pallas_call(
        _decoder_kernel,
        out_shape=jax.ShapeDtypeStruct((N, OUTC, HW), jnp.float32),
        grid=grid,
        in_specs=[act_spec, act_spec, act_spec,
                  full(w1_t), full(b1_t),
                  full(w2_t), full(b2_t),
                  full(bns_t), full(bnb_t),
                  full(wout_t), full(bout_t)],
        out_specs=pl.BlockSpec((1, OUTC, T), lambda n, j: (n, 0, j)),
        compiler_params=pltpu.CompilerParams(
            dimension_semantics=("parallel", "parallel"),
            vmem_limit_bytes=32 * 1024 * 1024),
    )(h_r, c_r, enc_r, w1_t, b1_t, w2_t, b2_t, bns_t, bnb_t, wout_t, bout_t)

    # (N, OUTC, H*W) -> (N, OUTC, H, W) -> unsqueeze(1).  Pure reshape.
    return out_cm.reshape(N, OUTC, H, W)[:, None, :, :, :]


def conv_decoder_reference(encoder_last_state, h, c, params):
    """Pure-JAX reference with the original (un-folded) math, pixel-row layout."""
    N, C, H, W = h.shape
    P = N * H * W
    to_rows = lambda x: jnp.transpose(x, (0, 2, 3, 1)).reshape(P, C)
    h_r, c_r, enc_r = to_rows(h), to_rows(c), to_rows(encoder_last_state)
    (w1, b1, w2, b2, bn_scale, bn_shift, wout, bout) = params

    def lstm(x, h_cur, c_cur, w, b):
        cc = jnp.maximum(jnp.concatenate([x, h_cur], axis=-1) @ w + b, 0.0)
        i = jax.nn.sigmoid(cc[:, 0 * C:1 * C])
        f = jax.nn.sigmoid(cc[:, 1 * C:2 * C])
        o = jax.nn.sigmoid(cc[:, 2 * C:3 * C])
        g = jnp.tanh(cc[:, 3 * C:4 * C])
        c_next = f * c_cur + i * g
        return o * jnp.tanh(c_next), c_next

    h1, c1 = lstm(h_r, h_r, c_r, w1, b1)
    h2, _ = lstm(h1, h1, c1, w2, b2)
    hbn = h2 * bn_scale + bn_shift
    hres = hbn + enc_r
    out_rows = hres @ wout + bout
    OUTC = wout.shape[1]
    out = out_rows.reshape(N, H, W, OUTC).transpose(0, 3, 1, 2)
    return out[:, None, :, :, :]


def make_params(key, C, out_channels):
    """Deterministic parameter init. 1x1 conv weights stored as (in, out) matrices."""
    ks = jax.random.split(key, 9)
    scale = 0.1
    w1 = scale * jax.random.normal(ks[0], (2 * C, 4 * C), jnp.float32)
    b1 = scale * jax.random.normal(ks[1], (1, 4 * C), jnp.float32)
    w2 = scale * jax.random.normal(ks[2], (2 * C, 4 * C), jnp.float32)
    b2 = scale * jax.random.normal(ks[3], (1, 4 * C), jnp.float32)
    # BatchNorm2d (eval): gamma, beta, running_mean, running_var (>0), eps=1e-5.
    gamma = 1.0 + 0.1 * jax.random.normal(ks[4], (1, C), jnp.float32)
    beta = 0.1 * jax.random.normal(ks[5], (1, C), jnp.float32)
    r_mean = 0.1 * jax.random.normal(ks[6], (1, C), jnp.float32)
    r_var = jnp.abs(1.0 + 0.1 * jax.random.normal(ks[7], (1, C), jnp.float32))
    eps = 1e-5
    bn_scale = gamma / jnp.sqrt(r_var + eps)
    bn_shift = beta - r_mean * bn_scale
    wout = scale * jax.random.normal(ks[8], (C, out_channels), jnp.float32)
    bout = jnp.zeros((1, out_channels), jnp.float32) + 0.01
    return (w1, b1, w2, b2, bn_scale, bn_shift, wout, bout)


if __name__ == "__main__":
    # Shapes consistent with ConvDecoder(hidden_channels=128, output_channels=1,
    # kernel_size=1):  C = hidden_channels // 2 = 64, batch = 2, spatial = 16x16.
    hidden_channels = 128
    output_channels = 1
    C = hidden_channels // 2
    N, H, W = 2, 16, 16

    key = jax.random.PRNGKey(0)
    k_enc, k_h, k_c, k_p = jax.random.split(key, 4)
    encoder_last_state = jax.random.normal(k_enc, (N, C, H, W), jnp.float32)
    h0 = jax.random.normal(k_h, (N, C, H, W), jnp.float32)
    c0 = jax.random.normal(k_c, (N, C, H, W), jnp.float32)
    params = make_params(k_p, C, output_channels)

    out = conv_decoder_forward(encoder_last_state, h0, c0, params)
    out = jax.block_until_ready(out)

    ref = conv_decoder_reference(encoder_last_state, h0, c0, params)
    assert out.shape == (N, 1, output_channels, H, W), out.shape
    np.testing.assert_allclose(np.asarray(out), np.asarray(ref), rtol=1e-5, atol=1e-5)

    print("KERNEL_OK")
</pallas_src>

<mosaic_0001>
module attributes {stable_mosaic.version = 11 : i64} {
  func.func @_decoder_kernel(%arg0: i32, %arg1: i32, %arg2: memref<1x64x256xf32, #tpu.memory_space<vmem>>, %arg3: memref<1x64x256xf32, #tpu.memory_space<vmem>>, %arg4: memref<1x64x256xf32, #tpu.memory_space<vmem>>, %arg5: memref<256x64xf32, #tpu.memory_space<vmem>>, %arg6: memref<256x1xf32, #tpu.memory_space<vmem>>, %arg7: memref<256x64xf32, #tpu.memory_space<vmem>>, %arg8: memref<256x1xf32, #tpu.memory_space<vmem>>, %arg9: memref<64x1xf32, #tpu.memory_space<vmem>>, %arg10: memref<64x1xf32, #tpu.memory_space<vmem>>, %arg11: memref<1x64xf32, #tpu.memory_space<vmem>>, %arg12: memref<1x1xf32, #tpu.memory_space<vmem>>, %arg13: memref<1x1x256xf32, #tpu.memory_space<vmem>>) attributes {dimension_semantics = [#tpu.dimension_semantics<parallel>, #tpu.dimension_semantics<parallel>], iteration_bounds = array<i64: 2, 1>, scalar_prefetch = 0 : i64, scratch_operands = 0 : i64, tpu.core_type = #tpu.core_type<tc>, window_params = [{transform_indices = @transform_0, window_bounds = array<i64: 1, 64, 256>}, {transform_indices = @transform_1, window_bounds = array<i64: 1, 64, 256>}, {transform_indices = @transform_2, window_bounds = array<i64: 1, 64, 256>}, {pipeline_mode = #tpu.pipeline_mode<synchronous>, transform_indices = @transform_3, window_bounds = array<i64: 256, 64>}, {pipeline_mode = #tpu.pipeline_mode<synchronous>, transform_indices = @transform_4, window_bounds = array<i64: 256, 1>}, {pipeline_mode = #tpu.pipeline_mode<synchronous>, transform_indices = @transform_5, window_bounds = array<i64: 256, 64>}, {pipeline_mode = #tpu.pipeline_mode<synchronous>, transform_indices = @transform_6, window_bounds = array<i64: 256, 1>}, {pipeline_mode = #tpu.pipeline_mode<synchronous>, transform_indices = @transform_7, window_bounds = array<i64: 64, 1>}, {pipeline_mode = #tpu.pipeline_mode<synchronous>, transform_indices = @transform_8, window_bounds = array<i64: 64, 1>}, {pipeline_mode = #tpu.pipeline_mode<synchronous>, transform_indices = @transform_9, window_bounds = array<i64: 1, 64>}, {pipeline_mode = #tpu.pipeline_mode<synchronous>, transform_indices = @transform_10, window_bounds = array<i64: 1, 1>}, {transform_indices = @transform_11, window_bounds = array<i64: 1, 1, 256>}]} {
    %c0 = arith.constant 0 : index
    %c0_0 = arith.constant 0 : index
    %c0_1 = arith.constant 0 : index
    %0 = vector.load %arg2[%c0, %c0_0, %c0_1] : memref<1x64x256xf32, #tpu.memory_space<vmem>>, vector<1x64x256xf32>
    %1 = vector.shape_cast %0 : vector<1x64x256xf32> to vector<64x256xf32>
    %c0_2 = arith.constant 0 : index
    %c0_3 = arith.constant 0 : index
    %c0_4 = arith.constant 0 : index
    %2 = vector.load %arg3[%c0_2, %c0_3, %c0_4] : memref<1x64x256xf32, #tpu.memory_space<vmem>>, vector<1x64x256xf32>
    %3 = vector.shape_cast %2 : vector<1x64x256xf32> to vector<64x256xf32>
    %c0_5 = arith.constant 0 : index
    %c0_6 = arith.constant 0 : index
    %4 = vector.load %arg5[%c0_5, %c0_6] : memref<256x64xf32, #tpu.memory_space<vmem>>, vector<256x64xf32>
    %cst = arith.constant dense<0.000000e+00> : vector<256x256xf32>
    %5 = tpu.matmul %4, %1, %cst {dimension_numbers = #tpu.dot_dimension_numbers<[1], [0], [0], [1], [0, 0, 1, 1], [], []>} : vector<256x64xf32>, vector<64x256xf32>, vector<256x256xf32> -> vector<256x256xf32>
    %c0_7 = arith.constant 0 : index
    %c0_8 = arith.constant 0 : index
    %6 = vector.load %arg6[%c0_7, %c0_8] : memref<256x1xf32, #tpu.memory_space<vmem>>, vector<256x1xf32>
    %7 = vector.broadcast %6 : vector<256x1xf32> to vector<256x256xf32>
    %8 = arith.addf %5, %7 : vector<256x256xf32>
    %cst_9 = arith.constant 0.000000e+00 : f32
    %9 = vector.broadcast %cst_9 : f32 to vector<256x256xf32>
    %10 = arith.maximumf %8, %9 : vector<256x256xf32>
    %11 = vector.extract_strided_slice %10 {offsets = [0, 0], sizes = [192, 256], strides = [1, 1]} : vector<256x256xf32> to vector<192x256xf32>
    %12 = arith.negf %11 : vector<192x256xf32>
    %13 = math.exp %12 : vector<192x256xf32>
    %cst_10 = arith.constant 1.000000e+00 : f32
    %14 = vector.broadcast %cst_10 : f32 to vector<192x256xf32>
    %15 = arith.addf %14, %13 : vector<192x256xf32>
    %16 = arith.divf %14, %15 : vector<192x256xf32>
    %17 = vector.extract_strided_slice %16 {offsets = [0, 0], sizes = [64, 256], strides = [1, 1]} : vector<192x256xf32> to vector<64x256xf32>
    %18 = vector.extract_strided_slice %16 {offsets = [64, 0], sizes = [64, 256], strides = [1, 1]} : vector<192x256xf32> to vector<64x256xf32>
    %19 = vector.extract_strided_slice %16 {offsets = [128, 0], sizes = [64, 256], strides = [1, 1]} : vector<192x256xf32> to vector<64x256xf32>
    %20 = vector.extract_strided_slice %10 {offsets = [192, 0], sizes = [64, 256], strides = [1, 1]} : vector<256x256xf32> to vector<64x256xf32>
    %21 = math.tanh %20 : vector<64x256xf32>
    %22 = arith.mulf %18, %3 : vector<64x256xf32>
    %23 = arith.mulf %17, %21 : vector<64x256xf32>
    %24 = arith.addf %22, %23 : vector<64x256xf32>
    %25 = math.tanh %24 : vector<64x256xf32>
    %26 = arith.mulf %19, %25 : vector<64x256xf32>
    %c0_11 = arith.constant 0 : index
    %c0_12 = arith.constant 0 : index
    %27 = vector.load %arg7[%c0_11, %c0_12] : memref<256x64xf32, #tpu.memory_space<vmem>>, vector<256x64xf32>
    %cst_13 = arith.constant dense<0.000000e+00> : vector<256x256xf32>
    %28 = tpu.matmul %27, %26, %cst_13 {dimension_numbers = #tpu.dot_dimension_numbers<[1], [0], [0], [1], [0, 0, 1, 1], [], []>} : vector<256x64xf32>, vector<64x256xf32>, vector<256x256xf32> -> vector<256x256xf32>
    %c0_14 = arith.constant 0 : index
    %c0_15 = arith.constant 0 : index
    %29 = vector.load %arg8[%c0_14, %c0_15] : memref<256x1xf32, #tpu.memory_space<vmem>>, vector<256x1xf32>
    %30 = vector.broadcast %29 : vector<256x1xf32> to vector<256x256xf32>
    %31 = arith.addf %28, %30 : vector<256x256xf32>
    %cst_16 = arith.constant 0.000000e+00 : f32
    %32 = vector.broadcast %cst_16 : f32 to vector<256x256xf32>
    %33 = arith.maximumf %31, %32 : vector<256x256xf32>
    %34 = vector.extract_strided_slice %33 {offsets = [0, 0], sizes = [192, 256], strides = [1, 1]} : vector<256x256xf32> to vector<192x256xf32>
    %35 = arith.negf %34 : vector<192x256xf32>
    %36 = math.exp %35 : vector<192x256xf32>
    %cst_17 = arith.constant 1.000000e+00 : f32
    %37 = vector.broadcast %cst_17 : f32 to vector<192x256xf32>
    %38 = arith.addf %37, %36 : vector<192x256xf32>
    %39 = arith.divf %37, %38 : vector<192x256xf32>
    %40 = vector.extract_strided_slice %39 {offsets = [0, 0], sizes = [64, 256], strides = [1, 1]} : vector<192x256xf32> to vector<64x256xf32>
    %41 = vector.extract_strided_slice %39 {offsets = [64, 0], sizes = [64, 256], strides = [1, 1]} : vector<192x256xf32> to vector<64x256xf32>
    %42 = vector.extract_strided_slice %39 {offsets = [128, 0], sizes = [64, 256], strides = [1, 1]} : vector<192x256xf32> to vector<64x256xf32>
    %43 = vector.extract_strided_slice %33 {offsets = [192, 0], sizes = [64, 256], strides = [1, 1]} : vector<256x256xf32> to vector<64x256xf32>
    %44 = math.tanh %43 : vector<64x256xf32>
    %45 = arith.mulf %41, %24 : vector<64x256xf32>
    %46 = arith.mulf %40, %44 : vector<64x256xf32>
    %47 = arith.addf %45, %46 : vector<64x256xf32>
    %48 = math.tanh %47 : vector<64x256xf32>
    %49 = arith.mulf %42, %48 : vector<64x256xf32>
    %c0_18 = arith.constant 0 : index
    %c0_19 = arith.constant 0 : index
    %50 = vector.load %arg9[%c0_18, %c0_19] : memref<64x1xf32, #tpu.memory_space<vmem>>, vector<64x1xf32>
    %51 = vector.broadcast %50 : vector<64x1xf32> to vector<64x256xf32>
    %52 = arith.mulf %49, %51 : vector<64x256xf32>
    %c0_20 = arith.constant 0 : index
    %c0_21 = arith.constant 0 : index
    %53 = vector.load %arg10[%c0_20, %c0_21] : memref<64x1xf32, #tpu.memory_space<vmem>>, vector<64x1xf32>
    %54 = vector.broadcast %53 : vector<64x1xf32> to vector<64x256xf32>
    %55 = arith.addf %52, %54 : vector<64x256xf32>
    %c0_22 = arith.constant 0 : index
    %c0_23 = arith.constant 0 : index
    %c0_24 = arith.constant 0 : index
    %56 = vector.load %arg4[%c0_22, %c0_23, %c0_24] : memref<1x64x256xf32, #tpu.memory_space<vmem>>, vector<1x64x256xf32>
    %57 = vector.shape_cast %56 : vector<1x64x256xf32> to vector<64x256xf32>
    %58 = arith.addf %55, %57 : vector<64x256xf32>
    %c0_25 = arith.constant 0 : index
    %c0_26 = arith.constant 0 : index
    %59 = vector.load %arg11[%c0_25, %c0_26] : memref<1x64xf32, #tpu.memory_space<vmem>>, vector<1x64xf32>
    %cst_27 = arith.constant dense<0.000000e+00> : vector<1x256xf32>
    %60 = tpu.matmul %59, %58, %cst_27 {dimension_numbers = #tpu.dot_dimension_numbers<[1], [0], [0], [1], [0, 0, 1, 1], [], []>} : vector<1x64xf32>, vector<64x256xf32>, vector<1x256xf32> -> vector<1x256xf32>
    %c0_28 = arith.constant 0 : index
    %c0_29 = arith.constant 0 : index
    %61 = vector.load %arg12[%c0_28, %c0_29] : memref<1x1xf32, #tpu.memory_space<vmem>>, vector<1x1xf32>
    %62 = vector.broadcast %61 : vector<1x1xf32> to vector<1x256xf32>
    %63 = arith.addf %60, %62 : vector<1x256xf32>
    %c0_30 = arith.constant 0 : index
    %c0_31 = arith.constant 0 : index
    %c0_32 = arith.constant 0 : index
    %64 = vector.load %arg13[%c0_30, %c0_31, %c0_32] : memref<1x1x256xf32, #tpu.memory_space<vmem>>, vector<1x1x256xf32>
    %65 = vector.shape_cast %64 : vector<1x1x256xf32> to vector<1x256xf32>
    %66 = vector.shape_cast %63 : vector<1x256xf32> to vector<1x1x256xf32>
    tpu.vector_store %arg13[%c0_30, %c0_31, %c0_32], %66 {strides = array<i32>} : memref<1x1x256xf32, #tpu.memory_space<vmem>>, vector<1x1x256xf32>,
    return
  }
  func.func @transform_0(%arg0: i32, %arg1: i32) -> (i32, i32, i32) {
    %c0_i32 = arith.constant 0 : i32
    %c0_i32_0 = arith.constant 0 : i32
    return %arg0, %c0_i32, %arg1 : i32, i32, i32
  }
  func.func @transform_1(%arg0: i32, %arg1: i32) -> (i32, i32, i32) {
    %c0_i32 = arith.constant 0 : i32
    %c0_i32_0 = arith.constant 0 : i32
    return %arg0, %c0_i32, %arg1 : i32, i32, i32
  }
  func.func @transform_2(%arg0: i32, %arg1: i32) -> (i32, i32, i32) {
    %c0_i32 = arith.constant 0 : i32
    %c0_i32_0 = arith.constant 0 : i32
    return %arg0, %c0_i32, %arg1 : i32, i32, i32
  }
  func.func @transform_3(%arg0: i32, %arg1: i32) -> (i32, i32) {
    %c0_i32 = arith.constant 0 : i32
    %c0_i32_0 = arith.constant 0 : i32
    %c0_i32_1 = arith.constant 0 : i32
    return %c0_i32, %c0_i32_0 : i32, i32
  }
  func.func @transform_4(%arg0: i32, %arg1: i32) -> (i32, i32) {
    %c0_i32 = arith.constant 0 : i32
    %c0_i32_0 = arith.constant 0 : i32
    %c0_i32_1 = arith.constant 0 : i32
    return %c0_i32, %c0_i32_0 : i32, i32
  }
  func.func @transform_5(%arg0: i32, %arg1: i32) -> (i32, i32) {
    %c0_i32 = arith.constant 0 : i32
    %c0_i32_0 = arith.constant 0 : i32
    %c0_i32_1 = arith.constant 0 : i32
    return %c0_i32, %c0_i32_0 : i32, i32
  }
  func.func @transform_6(%arg0: i32, %arg1: i32) -> (i32, i32) {
    %c0_i32 = arith.constant 0 : i32
    %c0_i32_0 = arith.constant 0 : i32
    %c0_i32_1 = arith.constant 0 : i32
    return %c0_i32, %c0_i32_0 : i32, i32
  }
  func.func @transform_7(%arg0: i32, %arg1: i32) -> (i32, i32) {
    %c0_i32 = arith.constant 0 : i32
    %c0_i32_0 = arith.constant 0 : i32
    %c0_i32_1 = arith.constant 0 : i32
    return %c0_i32, %c0_i32_0 : i32, i32
  }
  func.func @transform_8(%arg0: i32, %arg1: i32) -> (i32, i32) {
    %c0_i32 = arith.constant 0 : i32
    %c0_i32_0 = arith.constant 0 : i32
    %c0_i32_1 = arith.constant 0 : i32
    return %c0_i32, %c0_i32_0 : i32, i32
  }
  func.func @transform_9(%arg0: i32, %arg1: i32) -> (i32, i32) {
    %c0_i32 = arith.constant 0 : i32
    %c0_i32_0 = arith.constant 0 : i32
    %c0_i32_1 = arith.constant 0 : i32
    return %c0_i32, %c0_i32_0 : i32, i32
  }
  func.func @transform_10(%arg0: i32, %arg1: i32) -> (i32, i32) {
    %c0_i32 = arith.constant 0 : i32
    %c0_i32_0 = arith.constant 0 : i32
    %c0_i32_1 = arith.constant 0 : i32
    return %c0_i32, %c0_i32_0 : i32, i32
  }
  func.func @transform_11(%arg0: i32, %arg1: i32) -> (i32, i32, i32) {
    %c0_i32 = arith.constant 0 : i32
    %c0_i32_0 = arith.constant 0 : i32
    return %arg0, %c0_i32, %arg1 : i32, i32, i32
  }
}

</mosaic_0001>

<bundles_post_ra>
// kernel: tpu_custom_call.1
= control target key start
LH: loop header
LB: loop body
LE: loop exit
PB: predicated region body
PF: predicated region fallthrough
CT: control target
= control target key end

     0   :  { %s5195_s0 = inlined_call_operand.vmem [shape: f32[2,64,256], index: 0, kind: input, shape index: {}]   ;;  %s5196_s1 = inlined_call_operand.vmem [shape: f32[2,64,256], index: 1, kind: input, shape index: {}]   ;;  %s5197_s2 = inlined_call_operand.vmem [shape: f32[2,64,256], index: 2, kind: input, shape index: {}]   ;;  %s5198_s3 = inlined_call_operand.vmem [shape: f32[256,64], index: 3, kind: input, shape index: {}]   ;;  %s5199_s4 = inlined_call_operand.vmem [shape: f32[256,1], index: 4, kind: input, shape index: {}]   ;;  %s5200_s5 = inlined_call_operand.vmem [shape: f32[256,64], index: 5, kind: input, shape index: {}]   ;;  %s5201_s6 = inlined_call_operand.vmem [shape: f32[256,1], index: 6, kind: input, shape index: {}]   ;;  %s5202_s7 = inlined_call_operand.vmem [shape: f32[64,1], index: 7, kind: input, shape index: {}]   ;;  %s5203_s8 = inlined_call_operand.vmem [shape: f32[64,1], index: 8, kind: input, shape index: {}]   ;;  %s5204_s9 = inlined_call_operand.vmem [shape: f32[1,64], index: 9, kind: input, shape index: {}]   ;;  %s5205_s10 = inlined_call_operand.<no memory space> [shape: f32[1,1], index: 10, kind: input, shape index: {}]   ;;  %s5206_s11 = inlined_call_operand.hbm [shape: f32[2,1,256], index: 11, kind: output, shape index: {}]  }
   0x1   :  { %5210 = sst [smem:[#allocation22_spill]] %s5195_s0  ;;  %v16_v0 = vstv %s5205_s10 }
   0x2   :  { %17 = vst [vmem:[#allocation2] sm:$0x1] %v16_v0 }
   0x3   :  { %18 = vsyncpa [#allocation4], 0 }
   0x4   :  { %20 = vsyncpa [#allocation4 + $0x1], 0  ;;  %s3919_s19 = smov 0   ;;  %s3921_s20 = smov 0  }
   0x5   :  { %s3923_s21 = smov 0   ;;  %s3925_s22 = smov 0  }
   0x6   :  { %s3927_s23 = smov 0   ;;  %s3929_s24 = smov 0  }
   0x7 LB: > { %s2970_s10 = sadd.s32 4294967295, %s3850_s24   ;;  %s2971_s25 = sadd.s32 4294967294, %s3850_s24   ;;  %s3850_s24 = sphi %s3929_s24, %s26_s24   ;;  %s3846_s23 = sphi %s3927_s23, %s5250_s23   ;;  %s3842_s22 = sphi %s3925_s22, %s5249_s22   ;;  %s3838_s21 = sphi %s3923_s21, %s5248_s21   ;;  %s3834_s20 = sphi %s3921_s20, %s5247_s20   ;;  %s3830_s19 = sphi %s3919_s19, %s5246_s19  }
   0x8   : > { %s38_s26 = sadd.s32 1, %s3846_s23  ;;  %s299_s27 = sadd.s32 1, %s3838_s21 }
   0x9   : > { %p40_p0 = scmp.ge.s32.totalorder %s38_s26, 2  ;;  %p309_p1 = scmp.ne.s32.totalorder %s3838_s21, %s3834_s20 }
   0xa   : > { %p310_p2 = scmp.eq.s32.totalorder %s2970_s10, 1  ;;  %p315_p3 = scmp.ne.s32.totalorder %s3834_s20, %s3830_s19 }
   0xb   : > { %s5252_s26 = smov (%p40_p0, %s38_s26), 0  ;;  %p316_p5 = scmp.eq.s32.totalorder %s2971_s25, 1 }
   0xc   : > { %p3959_p4 = por %p310_p2, %p309_p1  ;;  %s294_s29 = ssub.s32 %s3846_s23, %s5252_s26 }
   0xd   : > { %p2974_p6 = scmp.ge.s32.totalorder %s3850_s24, 1  ;;  %p297_p7 = scmp.eq.s32.totalorder %s294_s29, 0 }
   0xe   : > { %p3966_p8 = por %p316_p5, %p315_p3  ;;  %p397_p9 = scmp.lt.s32.totalorder %s3850_s24, 3 }
   0xf   : > { %s3972_s12 = scalar_select %p297_p7, %s3838_s21, %s299_s27  }
  0x10   : > { %p398_p10 = pnand %p2974_p6, %p397_p9 }
  0x12   : > { %401 = sbr.rel (%p398_p10) target bundleno = 1051 (0x41b), region = 64 }
  0x19   : > { %p460_p11 = scmp.lt.s32.totalorder %s3842_s22, 1  ;;  %v554_v1 = vld [vmem:[%s5199_s4] sm:$0xff]  ;;  %v3852_v3 = vmov 0   ;;  %v555_v4 = vld [vmem:[%s5199_s4 + $0x8] sm:$0xff]  ;;  %v3853_v6 = vmov 0.0   ;;  %s5213_s0 = sld [smem:[#allocation22_spill]] }
  0x1a   : > { %v562_v2 = vld [vmem:[%s5199_s4 + $0x40] sm:$0xff]  ;;  %3258 = vset.pattern.permute.xlu0 %v3852_v3  ;;  %3259 = vset.pattern.permute.xlu1 %v3852_v3  ;;  %v563_v5 = vld [vmem:[%s5199_s4 + $0x48] sm:$0xff]  ;;  %v556_v7 = vld [vmem:[%s5199_s4 + $0x10] sm:$0xff]  ;;  %vm746_vm0 = vcmask 523264   ;;  %s456_s16 = sand.u32 1, %s3834_s20   ;;  %s3151_s18 = sshll.u32 %s3842_s22, 5 }
  0x1b   : > { %s461_s17 = scalar_select %p460_p11, %s3842_s22, 1  ;;  %588 = vperm.xlu0 %3258, %v554_v1   ;;  %628 = vperm.xlu1 %3259, %v562_v2   ;;  %v557_v11 = vld [vmem:[%s5199_s4 + $0x18] sm:$0xff]  ;;  %v564_v26 = vld [vmem:[%s5199_s4 + $0x50] sm:$0xff]  ;;  %v558_v34 = vld [vmem:[%s5199_s4 + $0x20] sm:$0xff] }
  0x1c   : > { %907 = vmatprep.mubr.f32.mxu0 %v3853_v6  ;;  %1932 = vmatprep.mubr.f32.mxu1 %v3853_v6  ;;  %v565_v29 = vld [vmem:[%s5199_s4 + $0x58] sm:$0xff]  ;;  %v559_v35 = vld [vmem:[%s5199_s4 + $0x28] sm:$0xff]  ;;  %v566_v37 = vld [vmem:[%s5199_s4 + $0x60] sm:$0xff]  ;;  %s5148_s13 = scalar_lea.hbm %s5206_s11, %s3151_s18  ;;  %s3855_s22 = smov [#allocation3]  }
  0x1d   : > { %s3990_s29 = sshll.u32 %s461_s17, 7  ;;  %v567_v38 = vld [vmem:[%s5199_s4 + $0x68] sm:$0xff]  ;;  %v522_v39 = vld [vmem:[%s5198_s3] sm:$0xff]  ;;  %v560_v40 = vld [vmem:[%s5199_s4 + $0x30] sm:$0xff]  ;;  %s3776_s14 = sshll.u32 %s3855_s22, 4  ;;  %s3777_s14 = int_to_ptr.vmem [resolvable:$false] %s3776_s14 }
  0x1e   : > { %v561_v41 = vld [vmem:[%s5199_s4 + $0x38] sm:$0xff]  ;;  %v523_v42 = vld [vmem:[%s5198_s3 + $0x8] sm:$0xff]  ;;  %v568_v43 = vld [vmem:[%s5199_s4 + $0x70] sm:$0xff] }
  0x1f   : > { %s3996_s15 = scalar_lea.vmem %s5213_s0, %s3990_s29  ;;  %593 = vperm.xlu0 %3258, %v555_v4   ;;  %633 = vperm.xlu1 %3259, %v563_v5   ;;  %v569_v44 = vld [vmem:[%s5199_s4 + $0x78] sm:$0xff]  ;;  %v524_v45 = vld [vmem:[%s5198_s3 + $0x10] sm:$0xff]  ;;  %v570_v46 = vld [vmem:[%s5199_s4 + $0x80] sm:$0xff]  ;;  %s4464_s0 = scalar_lea.vmem %s5196_s1, %s3990_s29 }
  0x20   : > { %v491_v8 = vld [vmem:[%s3996_s15 + $0x8] sm:$0xff]  ;;  %v493_v9 = vld [vmem:[%s3996_s15 + $0x18] sm:$0xff]  ;;  %v490_v10 = vld [vmem:[%s3996_s15] sm:$0xff] }
  0x21   : > { %v3152_v12 = vpack.c.bf16 %v493_v9, %v491_v8  ;;  %v492_v13 = vld [vmem:[%s3996_s15 + $0x10] sm:$0xff]  ;;  %v495_v14 = vld [vmem:[%s3996_s15 + $0x28] sm:$0xff]  ;;  %v497_v15 = vld [vmem:[%s3996_s15 + $0x38] sm:$0xff] }
  0x22   : > { %v3154_v16 = vpack.c.bf16 %v492_v13, %v490_v10  ;;  %v3156_v17 = vpack.c.bf16 %v497_v15, %v495_v14  ;;  %v494_v18 = vld [vmem:[%s3996_s15 + $0x20] sm:$0xff]  ;;  %v496_v19 = vld [vmem:[%s3996_s15 + $0x30] sm:$0xff]  ;;  %v499_v20 = vld [vmem:[%s3996_s15 + $0x48] sm:$0xff] }
  0x23   : > { %3153 = vmatprep.subr.bf16.mxu0 %v3152_v12  ;;  %v501_v21 = vld [vmem:[%s3996_s15 + $0x58] sm:$0xff]  ;;  %v3158_v22 = vpack.c.bf16 %v496_v19, %v494_v18  ;;  %598 = vperm.xlu0 %3258, %v556_v7   ;;  %v498_v24 = vld [vmem:[%s3996_s15 + $0x40] sm:$0xff]  ;;  %v500_v25 = vld [vmem:[%s3996_s15 + $0x50] sm:$0xff] }
  0x24   : > { %3155 = vmatpush1.bf16.msra.mxu0 %v3154_v16  ;;  %v3160_v23 = vpack.c.bf16 %v501_v21, %v499_v20  ;;  %603 = vperm.xlu1 %3259, %v557_v11   ;;  %v503_v27 = vld [vmem:[%s3996_s15 + $0x68] sm:$0xff]  ;;  %v505_v28 = vld [vmem:[%s3996_s15 + $0x78] sm:$0xff]  ;;  %v3162_v30 = vpack.c.bf16 %v500_v25, %v498_v24  ;;  %v502_v32 = vld [vmem:[%s3996_s15 + $0x60] sm:$0xff] }
  0x25   : > { %3157 = vmatprep.subr.bf16.mxu0 %v3156_v17  ;;  %v3164_v31 = vpack.c.bf16 %v505_v28, %v503_v27  ;;  %v504_v33 = vld [vmem:[%s3996_s15 + $0x70] sm:$0xff]  ;;  %v571_v47 = vld [vmem:[%s5199_s4 + $0x88] sm:$0xff]  ;;  %v525_v48 = vld [vmem:[%s5198_s3 + $0x18] sm:$0xff]  ;;  %s5063_s15 = scalar_lea.vmem %s5197_s2, %s3990_s29 }
  0x26   : > { %v3166_v36 = vpack.c.bf16 %v504_v33, %v502_v32  ;;  %v578_v49 = vld [vmem:[%s5199_s4 + $0xc0] sm:$0xff]  ;;  %v579_v50 = vld [vmem:[%s5199_s4 + $0xc8] sm:$0xff]  ;;  %v572_v52 = vld [vmem:[%s5199_s4 + $0x90] sm:$0xff] }
  0x27   : > { %638 = vperm.xlu0 %3258, %v564_v26   ;;  %v526_v51 = vld [vmem:[%s5198_s3 + $0x20] sm:$0xff]  ;;  %v573_v53 = vld [vmem:[%s5199_s4 + $0x98] sm:$0xff]  ;;  %v527_v54 = vld [vmem:[%s5198_s3 + $0x28] sm:$0xff] }
  0x28   : > { %3159 = vmatpush1.bf16.msra.mxu0 %v3158_v22  ;;  %643 = vperm.xlu1 %3259, %v565_v29   ;;  %v580_v55 = vld [vmem:[%s5199_s4 + $0xd0] sm:$0xff]  ;;  %v581_v56 = vld [vmem:[%s5199_s4 + $0xd8] sm:$0xff]  ;;  %v574_v58 = vld [vmem:[%s5199_s4 + $0xa0] sm:$0xff] }
  0x29   : > { %3161 = vmatprep.subr.bf16.mxu0 %v3160_v23  ;;  %v528_v57 = vld [vmem:[%s5198_s3 + $0x30] sm:$0xff]  ;;  %v575_v59 = vld [vmem:[%s5199_s4 + $0xa8] sm:$0xff]  ;;  %v529_v60 = vld [vmem:[%s5198_s3 + $0x38] sm:$0xff] }
  0x2a   : > { %v582_v61 = vld [vmem:[%s5199_s4 + $0xe0] sm:$0xff]  ;;  %v583_v62 = vld [vmem:[%s5199_s4 + $0xe8] sm:$0xff]  ;;  %v576_v0 = vld [vmem:[%s5199_s4 + $0xb0] sm:$0xff] }
  0x2b   : > { %608 = vperm.xlu0 %3258, %v558_v34   ;;  %v530_v63 = vld [vmem:[%s5198_s3 + $0x40] sm:$0xff]  ;;  %v577_v1 = vld [vmem:[%s5199_s4 + $0xb8] sm:$0xff]  ;;  %v531_v2 = vld [vmem:[%s5198_s3 + $0x48] sm:$0xff] }
  0x2c   : > { %3163 = vmatpush1.bf16.msra.mxu0 %v3162_v30  ;;  %613 = vperm.xlu1 %3259, %v559_v35   ;;  %v584_v3 = vld [vmem:[%s5199_s4 + $0xf0] sm:$0xff]  ;;  %v585_v4 = vld [vmem:[%s5199_s4 + $0xf8] sm:$0xff]  ;;  %v1580_v7 = vld [vmem:[%s5201_s6] sm:$0xff] }
  0x2d   : > { %3165 = vmatprep.subr.bf16.mxu0 %v3164_v31  ;;  %v532_v5 = vld [vmem:[%s5198_s3 + $0x50] sm:$0xff]  ;;  %v1581_v8 = vld [vmem:[%s5201_s6 + $0x8] sm:$0xff]  ;;  %v533_v9 = vld [vmem:[%s5198_s3 + $0x58] sm:$0xff] }
  0x2e   : > { %v1588_v10 = vld [vmem:[%s5201_s6 + $0x40] sm:$0xff]  ;;  %v1589_v11 = vld [vmem:[%s5201_s6 + $0x48] sm:$0xff]  ;;  %v1582_v13 = vld [vmem:[%s5201_s6 + $0x10] sm:$0xff] }
  0x2f   : > { %648 = vperm.xlu0 %3258, %v566_v37   ;;  %v534_v12 = vld [vmem:[%s5198_s3 + $0x60] sm:$0xff]  ;;  %v1583_v14 = vld [vmem:[%s5201_s6 + $0x18] sm:$0xff]  ;;  %v535_v15 = vld [vmem:[%s5198_s3 + $0x68] sm:$0xff] }
  0x30   : > { %3167 = vmatpush1.bf16.msra.mxu0 %v3166_v36  ;;  %653 = vperm.xlu1 %3259, %v567_v38   ;;  %v1590_v16 = vld [vmem:[%s5201_s6 + $0x50] sm:$0xff]  ;;  %v1591_v17 = vld [vmem:[%s5201_s6 + $0x58] sm:$0xff]  ;;  %v1584_v19 = vld [vmem:[%s5201_s6 + $0x20] sm:$0xff] }
  0x31   : > { %v536_v18 = vld [vmem:[%s5198_s3 + $0x70] sm:$0xff]  ;;  %v1585_v20 = vld [vmem:[%s5201_s6 + $0x28] sm:$0xff]  ;;  %v537_v21 = vld [vmem:[%s5198_s3 + $0x78] sm:$0xff] }
  0x32   : > { %v1592_v22 = vld [vmem:[%s5201_s6 + $0x60] sm:$0xff]  ;;  %v1593_v23 = vld [vmem:[%s5201_s6 + $0x68] sm:$0xff]  ;;  %v1586_v25 = vld [vmem:[%s5201_s6 + $0x30] sm:$0xff] }
  0x33   : > { %2982 = vmatmul.mubr.msk.f32.vlgmr.msra.gmra.mrb[0].mxu0 %vm746_vm0, %v522_v39  ;;  %618 = vperm.xlu0 %3258, %v560_v40   ;;  %v538_v24 = vld [vmem:[%s5198_s3 + $0x80] sm:$0xff]  ;;  %v1587_v26 = vld [vmem:[%s5201_s6 + $0x38] sm:$0xff]  ;;  %v539_v27 = vld [vmem:[%s5198_s3 + $0x88] sm:$0xff] }
  0x34   : > { %913 = vmatprep.mubr.f32.mxu0 %v3853_v6  ;;  %623 = vperm.xlu1 %3259, %v561_v41   ;;  %v1594_v28 = vld [vmem:[%s5201_s6 + $0x70] sm:$0xff]  ;;  %v1595_v29 = vld [vmem:[%s5201_s6 + $0x78] sm:$0xff]  ;;  %v1596_v31 = vld [vmem:[%s5201_s6 + $0x80] sm:$0xff] }
  0x35   : > { %v540_v30 = vld [vmem:[%s5198_s3 + $0x90] sm:$0xff]  ;;  %v1597_v32 = vld [vmem:[%s5201_s6 + $0x88] sm:$0xff]  ;;  %v541_v33 = vld [vmem:[%s5198_s3 + $0x98] sm:$0xff] }
  0x36   : > { %v1604_v34 = vld [vmem:[%s5201_s6 + $0xc0] sm:$0xff]  ;;  %v1605_v35 = vld [vmem:[%s5201_s6 + $0xc8] sm:$0xff]  ;;  %v1598_v37 = vld [vmem:[%s5201_s6 + $0x90] sm:$0xff] }
  0x37   : > { %2983 = vmatmul.mubr.msk.f32.gmra.mrb[2].mxu0 %vm746_vm0, %v523_v42  ;;  %658 = vperm.xlu0 %3258, %v568_v43   ;;  %v542_v36 = vld [vmem:[%s5198_s3 + $0xa0] sm:$0xff]  ;;  %v1599_v38 = vld [vmem:[%s5201_s6 + $0x98] sm:$0xff]  ;;  %v543_v39 = vld [vmem:[%s5198_s3 + $0xa8] sm:$0xff] }
  0x38   : > { %919 = vmatprep.mubr.f32.mxu0 %v3853_v6  ;;  %663 = vperm.xlu1 %3259, %v569_v44   ;;  %v1606_v40 = vld [vmem:[%s5201_s6 + $0xd0] sm:$0xff]  ;;  %v1607_v41 = vld [vmem:[%s5201_s6 + $0xd8] sm:$0xff]  ;;  %v1600_v43 = vld [vmem:[%s5201_s6 + $0xa0] sm:$0xff] }
  0x39   : > { %v544_v42 = vld [vmem:[%s5198_s3 + $0xb0] sm:$0xff]  ;;  %v1601_v44 = vld [vmem:[%s5201_s6 + $0xa8] sm:$0xff] }
  0x3b   : > { %2984 = vmatmul.mubr.msk.f32.gmra.mrb[4].mxu0 %vm746_vm0, %v524_v45  ;;  %668 = vperm.xlu0 %3258, %v570_v46   ;;  %v545_v45 = vld [vmem:[%s5198_s3 + $0xb8] sm:$0xff]  ;;  %v1608_v46 = vld [vmem:[%s5201_s6 + $0xe0] sm:$0xff] }
  0x3c   : > { %925 = vmatprep.mubr.f32.mxu0 %v3853_v6  ;;  %673 = vperm.xlu1 %3259, %v571_v47   ;;  %v1609_v47 = vld [vmem:[%s5201_s6 + $0xe8] sm:$0xff] }
  0x3f   : > { %2985 = vmatmul.mubr.msk.f32.gmra.mrb[6].mxu0 %vm746_vm0, %v525_v48  ;;  %708 = vperm.xlu0 %3258, %v578_v49   ;;  %v546_v48 = vld [vmem:[%s5198_s3 + $0xc0] sm:$0xff]  ;;  %v1602_v49 = vld [vmem:[%s5201_s6 + $0xb0] sm:$0xff] }
  0x40   : > { %931 = vmatprep.mubr.f32.mxu0 %v3853_v6  ;;  %713 = vperm.xlu1 %3259, %v579_v50   ;;  %v1603_v50 = vld [vmem:[%s5201_s6 + $0xb8] sm:$0xff] }
  0x43   : > { %2986 = vmatmul.mubr.msk.f32.gmra.mrb[8].mxu0 %vm746_vm0, %v526_v51  ;;  %678 = vperm.xlu0 %3258, %v572_v52   ;;  %v547_v51 = vld [vmem:[%s5198_s3 + $0xc8] sm:$0xff]  ;;  %v1610_v52 = vld [vmem:[%s5201_s6 + $0xf0] sm:$0xff] }
  0x44   : > { %937 = vmatprep.mubr.f32.mxu0 %v3853_v6  ;;  %683 = vperm.xlu1 %3259, %v573_v53   ;;  %v1611_v53 = vld [vmem:[%s5201_s6 + $0xf8] sm:$0xff] }
  0x47   : > { %2987 = vmatmul.mubr.msk.f32.gmra.mrb[10].mxu0 %vm746_vm0, %v527_v54  ;;  %718 = vperm.xlu0 %3258, %v580_v55   ;;  %v548_v54 = vld [vmem:[%s5198_s3 + $0xd0] sm:$0xff]  ;;  %v2573_v55 = vld [vmem:[%s5202_s7] sm:$0xff] }
  0x48   : > { %943 = vmatprep.mubr.f32.mxu0 %v3853_v6  ;;  %723 = vperm.xlu1 %3259, %v581_v56   ;;  %v2574_v56 = vld [vmem:[%s5202_s7 + $0x8] sm:$0xff] }
  0x4b   : > { %2988 = vmatmul.mubr.msk.f32.gmra.mrb[12].mxu0 %vm746_vm0, %v528_v57  ;;  %688 = vperm.xlu0 %3258, %v574_v58   ;;  %v549_v57 = vld [vmem:[%s5198_s3 + $0xd8] sm:$0xff]  ;;  %v2637_v58 = vld [vmem:[%s5203_s8] sm:$0xff] }
  0x4c   : > { %949 = vmatprep.mubr.f32.mxu0 %v3853_v6  ;;  %693 = vperm.xlu1 %3259, %v575_v59   ;;  %v2638_v59 = vld [vmem:[%s5203_s8 + $0x8] sm:$0xff] }
  0x4f   : > { %2989 = vmatmul.mubr.msk.f32.gmra.mrb[14].mxu0 %vm746_vm0, %v529_v60  ;;  %728 = vperm.xlu0 %3258, %v582_v61   ;;  %v550_v60 = vld [vmem:[%s5198_s3 + $0xe0] sm:$0xff]  ;;  %v2575_v61 = vld [vmem:[%s5202_s7 + $0x10] sm:$0xff] }
  0x50   : > { %955 = vmatprep.mubr.f32.mxu0 %v3853_v6  ;;  %733 = vperm.xlu1 %3259, %v583_v62   ;;  %v2576_v62 = vld [vmem:[%s5202_s7 + $0x18] sm:$0xff] }
  0x53   : > { %2990 = vmatmul.mubr.msk.f32.gmra.mrb[16].mxu0 %vm746_vm0, %v530_v63  ;;  %698 = vperm.xlu0 %3258, %v576_v0   ;;  %v551_v63 = vld [vmem:[%s5198_s3 + $0xe8] sm:$0xff]  ;;  %v2639_v0 = vld [vmem:[%s5203_s8 + $0x10] sm:$0xff] }
  0x54   : > { %961 = vmatprep.mubr.f32.mxu0 %v3853_v6  ;;  %703 = vperm.xlu1 %3259, %v577_v1   ;;  %v2640_v1 = vld [vmem:[%s5203_s8 + $0x18] sm:$0xff] }
  0x57   : > { %2991 = vmatmul.mubr.msk.f32.gmra.mrb[18].mxu0 %vm746_vm0, %v531_v2  ;;  %738 = vperm.xlu0 %3258, %v584_v3   ;;  %v552_v2 = vld [vmem:[%s5198_s3 + $0xf0] sm:$0xff]  ;;  %v2577_v3 = vld [vmem:[%s5202_s7 + $0x20] sm:$0xff] }
  0x58   : > { %967 = vmatprep.mubr.f32.mxu0 %v3853_v6  ;;  %743 = vperm.xlu1 %3259, %v585_v4   ;;  %v2578_v4 = vld [vmem:[%s5202_s7 + $0x28] sm:$0xff] }
  0x5b   : > { %2992 = vmatmul.mubr.msk.f32.gmra.mrb[20].mxu0 %vm746_vm0, %v532_v5  ;;  %1614 = vperm.xlu0 %3258, %v1580_v7   ;;  %v553_v5 = vld [vmem:[%s5198_s3 + $0xf8] sm:$0xff]  ;;  %v2641_v7 = vld [vmem:[%s5203_s8 + $0x20] sm:$0xff] }
  0x5c   : > { %973 = vmatprep.mubr.f32.mxu0 %v3853_v6  ;;  %1619 = vperm.xlu1 %3259, %v1581_v8   ;;  %v2642_v8 = vld [vmem:[%s5203_s8 + $0x28] sm:$0xff] }
  0x5f   : > { %2993 = vmatmul.mubr.msk.f32.gmra.mrb[22].mxu0 %vm746_vm0, %v533_v9  ;;  %1654 = vperm.xlu0 %3258, %v1588_v10   ;;  %v2579_v9 = vld [vmem:[%s5202_s7 + $0x30] sm:$0xff]  ;;  %v2580_v10 = vld [vmem:[%s5202_s7 + $0x38] sm:$0xff] }
  0x60   : > { %979 = vmatprep.mubr.f32.mxu0 %v3853_v6  ;;  %1659 = vperm.xlu1 %3259, %v1589_v11   ;;  %v2643_v11 = vld [vmem:[%s5203_s8 + $0x30] sm:$0xff] }
  0x63   : > { %2994 = vmatmul.mubr.msk.f32.gmra.mrb[24].mxu0 %vm746_vm0, %v534_v12  ;;  %1624 = vperm.xlu0 %3258, %v1582_v13   ;;  %v2644_v12 = vld [vmem:[%s5203_s8 + $0x38] sm:$0xff]  ;;  %v2734_v13 = vld [vmem:[#allocation2] sm:$0x1] }
  0x64   : > { %985 = vmatprep.mubr.f32.mxu0 %v3853_v6  ;;  %1629 = vperm.xlu1 %3259, %v1583_v14  }
  0x67   : > { %2995 = vmatmul.mubr.msk.f32.gmra.mrb[26].mxu0 %vm746_vm0, %v535_v15  ;;  %1664 = vperm.xlu0 %3258, %v1590_v16  }
  0x68   : > { %991 = vmatprep.mubr.f32.mxu0 %v3853_v6  ;;  %1669 = vperm.xlu1 %3259, %v1591_v17  }
  0x6b   : > { %2996 = vmatmul.mubr.msk.f32.gmra.mrb[28].mxu0 %vm746_vm0, %v536_v18  ;;  %1634 = vperm.xlu0 %3258, %v1584_v19  }
  0x6c   : > { %997 = vmatprep.mubr.f32.mxu0 %v3853_v6  ;;  %1639 = vperm.xlu1 %3259, %v1585_v20  }
  0x6f   : > { %2997 = vmatmul.mubr.msk.f32.gmra.mrb[30].mxu0 %vm746_vm0, %v537_v21  ;;  %1674 = vperm.xlu0 %3258, %v1592_v22  }
  0x70   : > { %1003 = vmatprep.mubr.f32.mxu0 %v3853_v6  ;;  %1679 = vperm.xlu1 %3259, %v1593_v23  }
  0x73   : > { %2998 = vmatmul.mubr.msk.f32.gmra.mrb[32].mxu0 %vm746_vm0, %v538_v24  ;;  %1644 = vperm.xlu0 %3258, %v1586_v25  }
  0x74   : > { %1009 = vmatprep.mubr.f32.mxu0 %v3853_v6  ;;  %1649 = vperm.xlu1 %3259, %v1587_v26  }
  0x77   : > { %2999 = vmatmul.mubr.msk.f32.gmra.mrb[34].mxu0 %vm746_vm0, %v539_v27  ;;  %1684 = vperm.xlu0 %3258, %v1594_v28  }
  0x78   : > { %1015 = vmatprep.mubr.f32.mxu0 %v3853_v6  ;;  %1689 = vperm.xlu1 %3259, %v1595_v29  }
  0x7b   : > { %3000 = vmatmul.mubr.msk.f32.gmra.mrb[36].mxu0 %vm746_vm0, %v540_v30  ;;  %1694 = vperm.xlu0 %3258, %v1596_v31  }
  0x7c   : > { %1021 = vmatprep.mubr.f32.mxu0 %v3853_v6  ;;  %1699 = vperm.xlu1 %3259, %v1597_v32  }
  0x7f   : > { %3001 = vmatmul.mubr.msk.f32.gmra.mrb[38].mxu0 %vm746_vm0, %v541_v33  ;;  %1734 = vperm.xlu0 %3258, %v1604_v34  }
  0x80   : > { %1027 = vmatprep.mubr.f32.mxu0 %v3853_v6  ;;  %1739 = vperm.xlu1 %3259, %v1605_v35  }
  0x83   : > { %3002 = vmatmul.mubr.msk.f32.gmra.mrb[40].mxu0 %vm746_vm0, %v542_v36  ;;  %1704 = vperm.xlu0 %3258, %v1598_v37  }
  0x84   : > { %1033 = vmatprep.mubr.f32.mxu0 %v3853_v6  ;;  %1709 = vperm.xlu1 %3259, %v1599_v38  }
  0x87   : > { %3003 = vmatmul.mubr.msk.f32.gmra.mrb[42].mxu0 %vm746_vm0, %v543_v39  ;;  %1744 = vperm.xlu0 %3258, %v1606_v40  }
  0x88   : > { %1039 = vmatprep.mubr.f32.mxu0 %v3853_v6  ;;  %1749 = vperm.xlu1 %3259, %v1607_v41  }
  0x8b   : > { %3004 = vmatmul.mubr.msk.f32.gmra.mrb[44].mxu0 %vm746_vm0, %v544_v42  ;;  %1714 = vperm.xlu0 %3258, %v1600_v43  }
  0x8c   : > { %1045 = vmatprep.mubr.f32.mxu0 %v3853_v6  ;;  %1719 = vperm.xlu1 %3259, %v1601_v44  }
  0x8f   : > { %3005 = vmatmul.mubr.msk.f32.gmra.mrb[46].mxu0 %vm746_vm0, %v545_v45  ;;  %1754 = vperm.xlu0 %3258, %v1608_v46  }
  0x90   : > { %1051 = vmatprep.mubr.f32.mxu0 %v3853_v6  ;;  %1759 = vperm.xlu1 %3259, %v1609_v47  }
  0x93   : > { %3006 = vmatmul.mubr.msk.f32.gmra.mrb[48].mxu0 %vm746_vm0, %v546_v48  ;;  %1724 = vperm.xlu0 %3258, %v1602_v49  }
  0x94   : > { %1057 = vmatprep.mubr.f32.mxu0 %v3853_v6  ;;  %1729 = vperm.xlu1 %3259, %v1603_v50  }
  0x97   : > { %3007 = vmatmul.mubr.msk.f32.gmra.mrb[50].mxu0 %vm746_vm0, %v547_v51  ;;  %1764 = vperm.xlu0 %3258, %v1610_v52  }
  0x98   : > { %1063 = vmatprep.mubr.f32.mxu0 %v3853_v6  ;;  %1769 = vperm.xlu1 %3259, %v1611_v53  }
  0x9a   : > { %v589_v14 = vpop.permute.xlu0 %588  ;;  %v4402_v15 = vpop.permute.xlu1 %628 }
  0x9b   : > { %3008 = vmatmul.mubr.msk.f32.gmra.mrb[52].mxu0 %vm746_vm0, %v548_v54  ;;  %2583 = vperm.xlu0 %3258, %v2573_v55  }
  0x9c   : > { %1069 = vmatprep.mubr.f32.mxu0 %v3853_v6  ;;  %2588 = vperm.xlu1 %3259, %v2574_v56  }
  0x9e   : > { %v594_v16 = vpop.permute.xlu0 %593  ;;  %v4404_v17 = vpop.permute.xlu1 %633 }
  0x9f   : > { %3009 = vmatmul.mubr.msk.f32.gmra.mrb[54].mxu0 %vm746_vm0, %v549_v57  ;;  %2647 = vperm.xlu0 %3258, %v2637_v58  }
  0xa0   : > { %1075 = vmatprep.mubr.f32.mxu0 %v3853_v6  ;;  %2652 = vperm.xlu1 %3259, %v2638_v59  }
  0xa2   : > { %v599_v18 = vpop.permute.xlu0 %598 }
  0xa3   : > { %3010 = vmatmul.mubr.msk.f32.gmra.mrb[56].mxu0 %vm746_vm0, %v550_v60  ;;  %2593 = vperm.xlu0 %3258, %v2575_v61   ;;  %v604_v24 = vpop.permute.xlu1 %603 }
  0xa4   : > { %1081 = vmatprep.mubr.f32.mxu0 %v3853_v6  ;;  %2598 = vperm.xlu1 %3259, %v2576_v62  }
  0xa6   : > { %v4406_v30 = vpop.permute.xlu0 %638 }
  0xa7   : > { %3011 = vmatmul.mubr.msk.f32.gmra.mrb[58].mxu0 %vm746_vm0, %v551_v63  ;;  %2657 = vperm.xlu0 %3258, %v2639_v0   ;;  %v4408_v39 = vpop.permute.xlu1 %643 }
  0xa8   : > { %1087 = vmatprep.mubr.f32.mxu0 %v3853_v6  ;;  %2662 = vperm.xlu1 %3259, %v2640_v1  }
  0xaa   : > { %v609_v43 = vpop.permute.xlu0 %608 }
  0xab   : > { %3012 = vmatmul.mubr.msk.f32.gmra.mrb[60].mxu0 %vm746_vm0, %v552_v2  ;;  %2603 = vperm.xlu0 %3258, %v2577_v3   ;;  %v614_v52 = vpop.permute.xlu1 %613 }
  0xac   : > { %1093 = vmatprep.mubr.f32.mxu0 %v3853_v6  ;;  %2608 = vperm.xlu1 %3259, %v2578_v4  }
  0xae   : > { %v4410_v58 = vpop.permute.xlu0 %648 }
  0xaf   : > { %3013 = vmatmul.mubr.msk.f32.gmra.mrb[62].mxu0 %vm746_vm0, %v553_v5  ;;  %2667 = vperm.xlu0 %3258, %v2641_v7   ;;  %v4412_v5 = vpop.permute.xlu1 %653 }
  0xb0   : > { %2811 = vmatprep.mubr.f32.mxu0 %v3853_v6  ;;  %2672 = vperm.xlu1 %3259, %v2642_v8  }
  0xb3   : > { %2613 = vperm.xlu0 %3258, %v2579_v9  }
  0xb4   : > { %2618 = vperm.xlu1 %3259, %v2580_v10  }
  0xb7   : > { %2677 = vperm.xlu0 %3258, %v2643_v11  }
  0xb8   : > { %2682 = vperm.xlu1 %3259, %v2644_v12  }
  0xbb   : > { %2737 = vperm.xlu0 %3258, %v2734_v13   ;;  %v619_v13 = vpop.permute.xlu0 %618 }
 0x106   : > { %v909_v19 = vpop.f32.mrb[0].mxu0 }
 0x107   : > { %v910_v20 = vadd.f32 %v909_v19, %v589_v14  ;;  %v911_v21 = vpop.f32.mrb[1].mxu0 }
 0x108   : > { %v912_v22 = vadd.f32 %v911_v21, %v589_v14 }
 0x109   : > { %v1100_v23 = vmax.f32 %v910_v20, 0.0 }
 0x10a   : > { %v1101_v25 = vmax.f32 %v912_v22, 0.0  ;;  %v915_v26 = vpop.f32.mrb[2].mxu0 }
 0x10b   : > { %v3014_v27 = vmul.f32 -1.442695, %v1100_v23  ;;  %v916_v28 = vadd.f32 %v915_v26, %v594_v16  ;;  %v917_v29 = vpop.f32.mrb[3].mxu0 }
 0x10c   : > { %v918_v31 = vadd.f32 %v917_v29, %v594_v16  ;;  %v3015_v32 = vmul.f32 -1.442695, %v1101_v25 }
 0x10d   : > { %v1102_v33 = vmax.f32 %v916_v28, 0.0  ;;  %3260 = vpow2.f32 %v3014_v27  ;;  %v624_v28 = vpop.permute.xlu1 %623 }
 0x10e   : > { %v1103_v34 = vmax.f32 %v918_v31, 0.0  ;;  %v921_v35 = vpop.f32.mrb[4].mxu0  ;;  %3262 = vpow2.f32 %v3015_v32 }
 0x10f   : > { %v3016_v36 = vmul.f32 -1.442695, %v1102_v33  ;;  %v922_v37 = vadd.f32 %v921_v35, %v599_v18  ;;  %v923_v38 = vpop.f32.mrb[5].mxu0 }
 0x110   : > { %v3017_v40 = vmul.f32 -1.442695, %v1103_v34  ;;  %v924_v41 = vadd.f32 %v923_v38, %v599_v18 }
 0x111   : > { %v1104_v42 = vmax.f32 %v922_v37, 0.0  ;;  %3264 = vpow2.f32 %v3016_v36 }
 0x112   : > { %v1105_v44 = vmax.f32 %v924_v41, 0.0  ;;  %v927_v45 = vpop.f32.mrb[6].mxu0  ;;  %3266 = vpow2.f32 %v3017_v40 }
 0x113   : > { %v3018_v46 = vmul.f32 -1.442695, %v1104_v42  ;;  %v928_v47 = vadd.f32 %v927_v45, %v604_v24  ;;  %v929_v48 = vpop.f32.mrb[7].mxu0 }
 0x114   : > { %v3019_v49 = vmul.f32 -1.442695, %v1105_v44  ;;  %v930_v50 = vadd.f32 %v929_v48, %v604_v24 }
 0x115   : > { %3268 = vpow2.f32 %v3018_v46  ;;  %v1106_v51 = vmax.f32 %v928_v47, 0.0 }
 0x116   : > { %v1107_v53 = vmax.f32 %v930_v50, 0.0  ;;  %v933_v54 = vpop.f32.mrb[8].mxu0  ;;  %3270 = vpow2.f32 %v3019_v49 }
 0x117   : > { %v3020_v55 = vmul.f32 -1.442695, %v1106_v51  ;;  %v934_v56 = vadd.f32 %v933_v54, %v609_v43  ;;  %v935_v57 = vpop.f32.mrb[9].mxu0  ;;  %v3261_v61 = vpop.eup %3260 }
 0x118   : > { %v3021_v59 = vmul.f32 -1.442695, %v1107_v53  ;;  %v936_v60 = vadd.f32 %v935_v57, %v609_v43  ;;  %v3263_v1 = vpop.eup %3262  ;;  %v1308_v7 = vadd.f32 1.0, %v3261_v61 }
 0x119   : > { %3272 = vpow2.f32 %v3020_v55  ;;  %v1108_v62 = vmax.f32 %v934_v56, 0.0  ;;  %v1309_v14 = vadd.f32 1.0, %v3263_v1 }
 0x11a   : > { %v1109_v63 = vmax.f32 %v936_v60, 0.0  ;;  %v939_v0 = vpop.f32.mrb[10].mxu0  ;;  %3274 = vpow2.f32 %v3021_v59 }
 0x11b   : > { %v3022_v2 = vmul.f32 -1.442695, %v1108_v62  ;;  %v940_v3 = vadd.f32 %v939_v0, %v614_v52  ;;  %v941_v4 = vpop.f32.mrb[11].mxu0  ;;  %v3265_v9 = vpop.eup %3264 }
 0x11c   : > { %v942_v8 = vadd.f32 %v941_v4, %v614_v52  ;;  %v3023_v10 = vmul.f32 -1.442695, %v1109_v63  ;;  %v3267_v12 = vpop.eup %3266  ;;  %v1310_v23 = vadd.f32 1.0, %v3265_v9 }
 0x11d   : > { %3276 = vpow2.f32 %v3022_v2  ;;  %v1110_v11 = vmax.f32 %v940_v3, 0.0  ;;  %v1311_v25 = vadd.f32 1.0, %v3267_v12 }
 0x11e   : > { %v945_v16 = vpop.f32.mrb[12].mxu0  ;;  %v1111_v20 = vmax.f32 %v942_v8, 0.0  ;;  %3278 = vrcp.f32 %v1308_v7 }
 0x11f   : > { %v3269_v18 = vpop.eup %3268  ;;  %v3024_v19 = vmul.f32 -1.442695, %v1110_v11  ;;  %v946_v21 = vadd.f32 %v945_v16, %v619_v13  ;;  %v947_v22 = vpop.f32.mrb[13].mxu0  ;;  %3280 = vpow2.f32 %v3023_v10 }
 0x120   : > { %v948_v24 = vadd.f32 %v947_v22, %v619_v13  ;;  %v3271_v27 = vpop.eup %3270  ;;  %3282 = vrcp.f32 %v1309_v14  ;;  %v1312_v29 = vadd.f32 1.0, %v3269_v18  ;;  %v3025_v33 = vmul.f32 -1.442695, %v1111_v20 }
 0x121   : > { %v1112_v26 = vmax.f32 %v946_v21, 0.0  ;;  %3284 = vpow2.f32 %v3024_v19  ;;  %v1313_v38 = vadd.f32 1.0, %v3271_v27 }
 0x122   : > { %v951_v31 = vpop.f32.mrb[14].mxu0  ;;  %v1113_v34 = vmax.f32 %v948_v24, 0.0  ;;  %3286 = vrcp.f32 %v1310_v23 }
 0x123   : > { %v3273_v32 = vpop.eup %3272  ;;  %v952_v35 = vadd.f32 %v951_v31, %v624_v28  ;;  %v953_v36 = vpop.f32.mrb[15].mxu0  ;;  %v3026_v37 = vmul.f32 -1.442695, %v1112_v26  ;;  %3288 = vrcp.f32 %v1311_v25 }
 0x124   : > { %v954_v40 = vadd.f32 %v953_v36, %v624_v28  ;;  %v3275_v41 = vpop.eup %3274  ;;  %3290 = vrcp.f32 %v1312_v29  ;;  %v1314_v42 = vadd.f32 1.0, %v3273_v32  ;;  %v3027_v46 = vmul.f32 -1.442695, %v1113_v34  ;;  %v659_v29 = vpop.permute.xlu0 %658 }
 0x125   : > { %v1114_v43 = vmax.f32 %v952_v35, 0.0  ;;  %3292 = vpow2.f32 %v3025_v33  ;;  %v1315_v49 = vadd.f32 1.0, %v3275_v41 }
 0x126   : > { %v957_v44 = vpop.f32.mrb[16].mxu0  ;;  %3294 = vpow2.f32 %v3026_v37  ;;  %v1115_v52 = vmax.f32 %v954_v40, 0.0 }
 0x127   : > { %v3277_v45 = vpop.eup %3276  ;;  %v958_v47 = vadd.f32 %v957_v44, %v4402_v15  ;;  %v959_v48 = vpop.f32.mrb[17].mxu0  ;;  %3296 = vrcp.f32 %v1313_v38  ;;  %v3028_v55 = vmul.f32 -1.442695, %v1114_v43 }
 0x128   : > { %v960_v50 = vadd.f32 %v959_v48, %v4402_v15  ;;  %v1316_v51 = vadd.f32 1.0, %v3277_v45  ;;  %v4416_v54 = vpop.eup %3278  ;;  %3298 = vrcp.f32 %v1314_v42  ;;  %v3029_v2 = vmul.f32 -1.442695, %v1115_v52 }
 0x129   : > { %v1116_v53 = vmax.f32 %v958_v47, 0.0  ;;  %v3281_v59 = vpop.eup %3280  ;;  %3300 = vpow2.f32 %v3027_v46  ;;  %v664_v47 = vpop.permute.xlu1 %663 }
 0x12a   : > { %v1117_v56 = vmax.f32 %v960_v50, 0.0  ;;  %v963_v57 = vpop.f32.mrb[18].mxu0  ;;  %v4419_v63 = vpop.eup %3282  ;;  %3302 = vrcp.f32 %v1315_v49  ;;  %v1317_v7 = vadd.f32 1.0, %v3281_v59 }
 0x12b   : > { %v3030_v60 = vmul.f32 -1.442695, %v1116_v53  ;;  %v964_v61 = vadd.f32 %v963_v57, %v4404_v17  ;;  %v965_v62 = vpop.f32.mrb[19].mxu0  ;;  %v3285_v1 = vpop.eup %3284  ;;  %3304 = vrcp.f32 %v1316_v51 }
 0x12c   : > { %v3031_v15 = vmul.f32 -1.442695, %v1117_v56  ;;  %v966_v0 = vadd.f32 %v965_v62, %v4404_v17  ;;  %v4422_v4 = vpop.eup %3286  ;;  %3306 = vpow2.f32 %v3028_v55  ;;  %v1318_v17 = vadd.f32 1.0, %v3285_v1  ;;  %v4446_v50 = vpop.permute.xlu0 %668 }
 0x12d   : > { %v1118_v3 = vmax.f32 %v964_v61, 0.0  ;;  %v4424_v10 = vpop.eup %3288  ;;  %3308 = vpow2.f32 %v3030_v60 }
 0x12e   : > { %v1119_v8 = vmax.f32 %v966_v0, 0.0  ;;  %v969_v9 = vpop.f32.mrb[20].mxu0  ;;  %v4427_v14 = vpop.eup %3290  ;;  %3310 = vpow2.f32 %v3031_v15 }
 0x12f   : > { %v3032_v11 = vmul.f32 -1.442695, %v1118_v3  ;;  %v970_v12 = vadd.f32 %v969_v9, %v4406_v30  ;;  %v971_v13 = vpop.f32.mrb[21].mxu0  ;;  %v3293_v18 = vpop.eup %3292  ;;  %3312 = vpow2.f32 %v3029_v2 }
 0x130   : > { %v972_v16 = vadd.f32 %v971_v13, %v4406_v30  ;;  %v3033_v19 = vmul.f32 -1.442695, %v1119_v8  ;;  %v3295_v21 = vpop.eup %3294  ;;  %3314 = vrcp.f32 %v1317_v7  ;;  %v1319_v30 = vadd.f32 1.0, %v3293_v18  ;;  %v4456_v9 = vpop.permute.xlu1 %673 }
 0x131   : > { %v1120_v20 = vmax.f32 %v970_v12, 0.0  ;;  %v4430_v24 = vpop.eup %3296  ;;  %3316 = vpow2.f32 %v3032_v11  ;;  %v1320_v34 = vadd.f32 1.0, %v3295_v21 }
 0x132   : > { %v1121_v22 = vmax.f32 %v972_v16, 0.0  ;;  %v975_v23 = vpop.f32.mrb[22].mxu0  ;;  %v4433_v28 = vpop.eup %3298  ;;  %3318 = vrcp.f32 %v1318_v17 }
 0x133   : > { %v3034_v25 = vmul.f32 -1.442695, %v1120_v20  ;;  %v976_v26 = vadd.f32 %v975_v23, %v4408_v39  ;;  %v977_v27 = vpop.f32.mrb[23].mxu0  ;;  %v4436_v33 = vpop.eup %3300  ;;  %3320 = vpow2.f32 %v3033_v19 }
 0x134   : > { %v3035_v31 = vmul.f32 -1.442695, %v1121_v22  ;;  %v978_v32 = vadd.f32 %v977_v27, %v4408_v39  ;;  %v4438_v36 = vpop.eup %3302  ;;  %v4458_v16 = vpop.permute.xlu0 %708 }
 0x135   : > { %v1122_v35 = vmax.f32 %v976_v26, 0.0  ;;  %3322 = vpow2.f32 %v3034_v25  ;;  %v4440_v40 = vpop.eup %3304 }
 0x136   : > { %v1123_v37 = vmax.f32 %v978_v32, 0.0  ;;  %v981_v38 = vpop.f32.mrb[24].mxu0  ;;  %3324 = vpow2.f32 %v3035_v31  ;;  %v4443_v44 = vpop.eup %3306 }
 0x137   : > { %v3036_v41 = vmul.f32 -1.442695, %v1122_v35  ;;  %v982_v42 = vadd.f32 %v981_v38, %v4410_v58  ;;  %v983_v43 = vpop.f32.mrb[25].mxu0  ;;  %3326 = vrcp.f32 %v1319_v30  ;;  %v3309_v46 = vpop.eup %3308  ;;  %v506_v35 = vld [vmem:[%s4464_s0] sm:$0xff] }
 0x138   : > { %v3037_v39 = vmul.f32 -1.442695, %v1123_v37  ;;  %v984_v45 = vadd.f32 %v983_v43, %v4410_v58  ;;  %3328 = vrcp.f32 %v1320_v34  ;;  %v3311_v49 = vpop.eup %3310  ;;  %v1324_v51 = vadd.f32 1.0, %v3309_v46 }
 0x139   : > { %v1124_v48 = vmax.f32 %v982_v42, 0.0  ;;  %3330 = vpow2.f32 %v3036_v41  ;;  %v4448_v55 = vpop.eup %3312  ;;  %v1325_v56 = vadd.f32 1.0, %v3311_v49  ;;  %v4471_v41 = vpop.permute.xlu1 %713  ;;  %v507_v42 = vld [vmem:[%s4464_s0 + $0x8] sm:$0xff] }
 0x13a   : > { %v1125_v52 = vmax.f32 %v984_v45, 0.0  ;;  %v987_v53 = vpop.f32.mrb[26].mxu0  ;;  %3332 = vpow2.f32 %v3037_v39  ;;  %v4451_v58 = vpop.eup %3314 }
 0x13b   : > { %v3038_v57 = vmul.f32 -1.442695, %v1124_v48  ;;  %v988_v59 = vadd.f32 %v987_v53, %v4412_v5  ;;  %v989_v60 = vpop.f32.mrb[27].mxu0  ;;  %3334 = vrcp.f32 %v1324_v51  ;;  %v3317_v15 = vpop.eup %3316 }
 0x13c   : > { %v3039_v61 = vmul.f32 -1.442695, %v1125_v52  ;;  %v990_v62 = vadd.f32 %v989_v60, %v4412_v5  ;;  %3336 = vrcp.f32 %v1325_v56  ;;  %v4454_v1 = vpop.eup %3318  ;;  %v1326_v2 = vadd.f32 1.0, %v3317_v15  ;;  %v4474_v48 = vpop.permute.xlu0 %678 }
 0x13d   : > { %v1126_v0 = vmax.f32 %v988_v59, 0.0  ;;  %3338 = vpow2.f32 %v3038_v57  ;;  %v3321_v8 = vpop.eup %3320 }
 0x13e   : > { %v1127_v3 = vmax.f32 %v990_v62, 0.0  ;;  %v993_v7 = vpop.f32.mrb[28].mxu0  ;;  %3340 = vpow2.f32 %v3039_v61  ;;  %v1327_v5 = vadd.f32 1.0, %v3321_v8  ;;  %v508_v62 = vld [vmem:[%s4464_s0 + $0x10] sm:$0xff] }
 0x13f   : > { %v3040_v11 = vmul.f32 -1.442695, %v1126_v0  ;;  %v994_v12 = vadd.f32 %v993_v7, %v659_v29  ;;  %v995_v13 = vpop.f32.mrb[29].mxu0  ;;  %v3323_v17 = vpop.eup %3322  ;;  %3342 = vrcp.f32 %v1326_v2 }
 0x140   : > { %v996_v18 = vadd.f32 %v995_v13, %v659_v29  ;;  %v3325_v19 = vpop.eup %3324  ;;  %v1328_v20 = vadd.f32 1.0, %v3323_v17  ;;  %v3041_v21 = vmul.f32 -1.442695, %v1127_v3 }
 0x141   : > { %3344 = vpow2.f32 %v3040_v11  ;;  %v1128_v22 = vmax.f32 %v994_v12, 0.0  ;;  %v4466_v23 = vpop.eup %3326  ;;  %v1329_v25 = vadd.f32 1.0, %v3325_v19  ;;  %v509_v11 = vld [vmem:[%s4464_s0 + $0x18] sm:$0xff] }
 0x142   : > { %3346 = vrcp.f32 %v1327_v5  ;;  %v1129_v26 = vmax.f32 %v996_v18, 0.0  ;;  %v999_v27 = vpop.f32.mrb[30].mxu0  ;;  %v4468_v30 = vpop.eup %3328 }
 0x143   : > { %3348 = vrcp.f32 %v1328_v20  ;;  %v3042_v29 = vmul.f32 -1.442695, %v1128_v22  ;;  %v1000_v31 = vadd.f32 %v999_v27, %v664_v47  ;;  %v1001_v32 = vpop.f32.mrb[31].mxu0  ;;  %v3331_v34 = vpop.eup %3330  ;;  %v510_v20 = vld [vmem:[%s4464_s0 + $0x20] sm:$0xff]  ;;  %v511_v27 = vld [vmem:[%s4464_s0 + $0x28] sm:$0xff] }
 0x144   : > { %3350 = vrcp.f32 %v1329_v25  ;;  %v1002_v37 = vadd.f32 %v1001_v32, %v664_v47  ;;  %v3333_v38 = vpop.eup %3332  ;;  %v1330_v43 = vadd.f32 1.0, %v3331_v34  ;;  %v3043_v39 = vmul.f32 -1.442695, %v1129_v26  ;;  %v684_v18 = vpop.permute.xlu1 %683 }
 0x145   : > { %3352 = vpow2.f32 %v3041_v21  ;;  %v1130_v45 = vmax.f32 %v1000_v31, 0.0  ;;  %v3335_v46 = vpop.eup %3334  ;;  %v1331_v49 = vadd.f32 1.0, %v3333_v38  ;;  %v4488_v26 = vpop.permute.xlu0 %718 }
 0x146   : > { %3354 = vpow2.f32 %v3042_v29  ;;  %v1131_v51 = vmax.f32 %v1002_v37, 0.0  ;;  %v1005_v52 = vpop.f32.mrb[32].mxu0  ;;  %v3337_v53 = vpop.eup %3336  ;;  %v4476_v56 = vmul.f32 %v3335_v46, %v506_v35 }
 0x147   : > { %3356 = vrcp.f32 %v1330_v43  ;;  %v3044_v47 = vmul.f32 -1.442695, %v1130_v45  ;;  %v1006_v57 = vadd.f32 %v1005_v52, %v4446_v50  ;;  %v1007_v59 = vpop.f32.mrb[33].mxu0  ;;  %v3339_v60 = vpop.eup %3338  ;;  %v4479_v61 = vmul.f32 %v3337_v53, %v507_v42 }
 0x148   : > { %3358 = vrcp.f32 %v1331_v49  ;;  %v1008_v15 = vadd.f32 %v1007_v59, %v4446_v50  ;;  %v3341_v0 = vpop.eup %3340  ;;  %v1332_v2 = vadd.f32 1.0, %v3339_v60  ;;  %v3045_v3 = vmul.f32 -1.442695, %v1131_v51  ;;  %v512_v49 = vld [vmem:[%s4464_s0 + $0x30] sm:$0xff] }
 0x149   : > { %3360 = vpow2.f32 %v3043_v39  ;;  %v1132_v7 = vmax.f32 %v1006_v57, 0.0  ;;  %v3343_v8 = vpop.eup %3342  ;;  %v1333_v12 = vadd.f32 1.0, %v3341_v0 }
 0x14a   : > { %3362 = vpow2.f32 %v3044_v47  ;;  %v1133_v13 = vmax.f32 %v1008_v15, 0.0  ;;  %v1011_v17 = vpop.f32.mrb[34].mxu0  ;;  %v4484_v19 = vmul.f32 %v3343_v8, %v508_v62  ;;  %v513_v47 = vld [vmem:[%s4464_s0 + $0x38] sm:$0xff]  ;;  %v4502_v15 = vpop.permute.xlu1 %723 }
 0x14b   : > { %v3345_v5 = vpop.eup %3344  ;;  %3364 = vrcp.f32 %v1332_v2  ;;  %v3046_v21 = vmul.f32 -1.442695, %v1132_v7  ;;  %v1012_v50 = vadd.f32 %v1011_v17, %v4456_v9  ;;  %v1013_v22 = vpop.f32.mrb[35].mxu0 }
 0x14c   : > { %v3347_v25 = vpop.eup %3346  ;;  %3366 = vrcp.f32 %v1333_v12  ;;  %v1334_v29 = vadd.f32 1.0, %v3345_v5  ;;  %v3047_v31 = vmul.f32 -1.442695, %v1133_v13  ;;  %v1014_v32 = vadd.f32 %v1013_v22, %v4456_v9  ;;  %v689_v7 = vpop.permute.xlu0 %688  ;;  %v514_v5 = vld [vmem:[%s4464_s0 + $0x40] sm:$0xff]  ;;  %v515_v22 = vld [vmem:[%s4464_s0 + $0x48] sm:$0xff] }
 0x14d   : > { %v3349_v34 = vpop.eup %3348  ;;  %v4492_v35 = vmul.f32 %v3347_v25, %v509_v11  ;;  %3368 = vpow2.f32 %v3045_v3  ;;  %v1134_v37 = vmax.f32 %v1012_v50, 0.0 }
 0x14e   : > { %v3351_v38 = vpop.eup %3350  ;;  %v4494_v42 = vmul.f32 %v3349_v34, %v510_v20  ;;  %3370 = vrcp.f32 %v1334_v29  ;;  %v1135_v43 = vmax.f32 %v1014_v32, 0.0  ;;  %v1017_v39 = vpop.f32.mrb[36].mxu0 }
 0x14f   : > { %v3353_v45 = vpop.eup %3352  ;;  %v4496_v46 = vmul.f32 %v3351_v38, %v511_v27  ;;  %3372 = vpow2.f32 %v3046_v21  ;;  %v3048_v51 = vmul.f32 -1.442695, %v1134_v37  ;;  %v1018_v9 = vadd.f32 %v1017_v39, %v4474_v48  ;;  %v1019_v52 = vpop.f32.mrb[37].mxu0  ;;  %v516_v39 = vld [vmem:[%s4464_s0 + $0x50] sm:$0xff] }
 0x150   : > { %v3355_v53 = vpop.eup %3354  ;;  %v1335_v57 = vadd.f32 1.0, %v3353_v45  ;;  %3374 = vpow2.f32 %v3047_v31  ;;  %v3049_v59 = vmul.f32 -1.442695, %v1135_v43  ;;  %v1020_v60 = vadd.f32 %v1019_v52, %v4474_v48 }
 0x151   : > { %v3357_v62 = vpop.eup %3356  ;;  %v1336_v0 = vadd.f32 1.0, %v3355_v53  ;;  %3376 = vpow2.f32 %v3048_v51  ;;  %v1136_v2 = vmax.f32 %v1018_v9, 0.0  ;;  %v1321_v38 = vadd.f32 1.0, %v4436_v33  ;;  %v694_v9 = vpop.permute.xlu1 %693 }
 0x152   : > { %v3359_v3 = vpop.eup %3358  ;;  %v4504_v8 = vmul.f32 %v3357_v62, %v512_v49  ;;  %3378 = vrcp.f32 %v1335_v57  ;;  %v1137_v11 = vmax.f32 %v1020_v60, 0.0  ;;  %v1023_v12 = vpop.f32.mrb[38].mxu0 }
 0x153   : > { %v3361_v13 = vpop.eup %3360  ;;  %v4506_v17 = vmul.f32 %v3359_v3, %v513_v47  ;;  %3380 = vrcp.f32 %v1336_v0  ;;  %v3050_v48 = vmul.f32 -1.442695, %v1136_v2  ;;  %v1024_v20 = vadd.f32 %v1023_v12, %v684_v18  ;;  %v1025_v21 = vpop.f32.mrb[39].mxu0 }
 0x154   : > { %v3363_v50 = vpop.eup %3362  ;;  %v1337_v25 = vadd.f32 1.0, %v3361_v13  ;;  %3382 = vpow2.f32 %v3049_v59  ;;  %v3051_v27 = vmul.f32 -1.442695, %v1137_v11  ;;  %v1026_v29 = vadd.f32 %v1025_v21, %v684_v18  ;;  %v4516_v59 = vpop.permute.xlu0 %728  ;;  %v517_v13 = vld [vmem:[%s4464_s0 + $0x58] sm:$0xff]  ;;  %v518_v21 = vld [vmem:[%s4464_s0 + $0x60] sm:$0xff] }
 0x155   : > { %v3365_v31 = vpop.eup %3364  ;;  %v1338_v32 = vadd.f32 1.0, %v3363_v50  ;;  %3384 = vpow2.f32 %v3050_v48  ;;  %v1138_v34 = vmax.f32 %v1024_v20, 0.0  ;;  %v1322_v2 = vadd.f32 1.0, %v4443_v44 }
 0x156   : > { %v3367_v37 = vpop.eup %3366  ;;  %v4511_v43 = vmul.f32 %v3365_v31, %v514_v5  ;;  %3386 = vrcp.f32 %v1337_v25  ;;  %v1139_v45 = vmax.f32 %v1026_v29, 0.0  ;;  %v1029_v49 = vpop.f32.mrb[40].mxu0  ;;  %v1323_v12 = vadd.f32 1.0, %v4448_v55 }
 0x157   : > { %v3369_v51 = vpop.eup %3368  ;;  %v4514_v52 = vmul.f32 %v3367_v37, %v515_v22  ;;  %3388 = vrcp.f32 %v1338_v32  ;;  %v3052_v18 = vmul.f32 -1.442695, %v1138_v34  ;;  %v1030_v53 = vadd.f32 %v1029_v49, %v689_v7  ;;  %v1031_v47 = vpop.f32.mrb[41].mxu0  ;;  %v519_v49 = vld [vmem:[%s4464_s0 + $0x68] sm:$0xff] }
 0x158   : > { %v3371_v57 = vpop.eup %3370  ;;  %v1339_v33 = vadd.f32 1.0, %v3369_v51  ;;  %3390 = vpow2.f32 %v3051_v27  ;;  %v3053_v60 = vmul.f32 -1.442695, %v1139_v45  ;;  %v1032_v62 = vadd.f32 %v1031_v47, %v689_v7  ;;  %v4524_v32 = vpop.permute.xlu1 %733  ;;  %v520_v47 = vld [vmem:[%s4464_s0 + $0x70] sm:$0xff] }
 0x159   : > { %v3373_v0 = vpop.eup %3372  ;;  %v4519_v3 = vmul.f32 %v3371_v57, %v516_v39  ;;  %3392 = vpow2.f32 %v3052_v18  ;;  %v1140_v5 = vmax.f32 %v1030_v53, 0.0  ;;  %v699_v39 = vpop.permute.xlu0 %698 }
 0x15a   : > { %v3375_v11 = vpop.eup %3374  ;;  %3394 = vrcp.f32 %v1339_v33  ;;  %v1035_v48 = vpop.f32.mrb[42].mxu0  ;;  %v1340_v50 = vadd.f32 1.0, %v3373_v0  ;;  %v1141_v22 = vmax.f32 %v1032_v62, 0.0 }
 0x15b   : > { %v3377_v20 = vpop.eup %3376  ;;  %3396 = vpow2.f32 %v3053_v60  ;;  %v1036_v7 = vadd.f32 %v1035_v48, %v694_v9  ;;  %v1037_v25 = vpop.f32.mrb[43].mxu0  ;;  %v1341_v44 = vadd.f32 1.0, %v3375_v11  ;;  %v3054_v51 = vmul.f32 -1.442695, %v1140_v5  ;;  %v521_v48 = vld [vmem:[%s4464_s0 + $0x78] sm:$0xff]  ;;  %s2975_s0 = sshll.u32 %s456_s16, 1 }
 0x15c   : > { %v3379_v27 = vpop.eup %3378  ;;  %3398 = vrcp.f32 %v1321_v38  ;;  %v1038_v29 = vadd.f32 %v1037_v25, %v694_v9  ;;  %v1342_v34 = vadd.f32 1.0, %v3377_v20  ;;  %v3055_v9 = vmul.f32 -1.442695, %v1141_v22  ;;  %v704_v22 = vpop.permute.xlu1 %703  ;;  %s458_s17 = scalar_lea.vmem [#allocation3], %s2975_s0  ;;  %s3778_s0 = scalar_lea.vmem %s3777_s14, 64 }
 0x15d   : > { %v3381_v31 = vpop.eup %3380  ;;  %3400 = vrcp.f32 %v1322_v2  ;;  %v4526_v55 = vmul.f32 %v3379_v27, %v517_v13  ;;  %v1142_v18 = vmax.f32 %v1036_v7, 0.0  ;;  %s2858_s10 = sshll.u32 %s458_s17, 4  ;;  %s5150_s10 = int_to_ptr.vmem [resolvable:$true] %s2858_s10 }
 0x15e   : > { %v3383_v37 = vpop.eup %3382  ;;  %3402 = vrcp.f32 %v1323_v12  ;;  %v4528_v45 = vmul.f32 %v3381_v31, %v518_v21  ;;  %v1041_v53 = vpop.f32.mrb[44].mxu0  ;;  %v1143_v57 = vmax.f32 %v1038_v29, 0.0  ;;  %s3772_s29 = scalar_lea.vmem %s5150_s10, 32  ;;  %p3779_p1 = scmp.lt.s32.totalorder %s5150_s10, %s3777_s14 }
 0x15f   : > { %v3385_v38 = vpop.eup %3384  ;;  %3404 = vrcp.f32 %v1340_v50  ;;  %v1042_v33 = vadd.f32 %v1041_v53, %v699_v39  ;;  %v1043_v60 = vpop.f32.mrb[45].mxu0  ;;  %v1343_v0 = vadd.f32 1.0, %v3383_v37  ;;  %v3056_v20 = vmul.f32 -1.442695, %v1142_v18  ;;  %p3773_p12 = scmp.ne.s32.totalorder %s5150_s10, %s3772_s29  ;;  %p3780_p2 = scmp.lt.s32.totalorder %s3778_s0, %s3772_s29 }
 0x160   : > { %v3387_v62 = vpop.eup %3386  ;;  %3406 = vrcp.f32 %v1341_v44  ;;  %v1044_v12 = vadd.f32 %v1043_v60, %v699_v39  ;;  %v3057_v7 = vmul.f32 -1.442695, %v1143_v57  ;;  %v1344_v29 = vadd.f32 1.0, %v3385_v38 }
 0x161   : > { %v3389_v2 = vpop.eup %3388  ;;  %v4532_v11 = vmul.f32 %v3387_v62, %v519_v49  ;;  %3408 = vrcp.f32 %v1342_v34  ;;  %v1144_v25 = vmax.f32 %v1042_v33, 0.0  ;;  %p3774_p13 = pnand %p3773_p12, %p3959_p4  ;;  %p3781_p3 = por %p3780_p2, %p3779_p1 }
 0x162   : > { %v3391_v13 = vpop.eup %3390  ;;  %v4534_v5 = vmul.f32 %v3389_v2, %v520_v47  ;;  %3410 = vpow2.f32 %v3054_v51  ;;  %v1047_v21 = vpop.f32.mrb[46].mxu0  ;;  %v1145_v49 = vmax.f32 %v1044_v12, 0.0 }
 0x163   : > { %v3393_v50 = vpop.eup %3392  ;;  %3412 = vpow2.f32 %v3055_v9  ;;  %v1049_v27 = vpop.f32.mrb[47].mxu0  ;;  %v1048_v31 = vadd.f32 %v1047_v21, %v704_v22  ;;  %v1345_v39 = vadd.f32 1.0, %v3391_v13  ;;  %v3058_v9 = vmul.f32 -1.442695, %v1144_v25  ;;  %p3775_p0 = pneg %p3774_p13 }
 0x164   : > { %v3395_v44 = vpop.eup %3394  ;;  %3414 = vrcp.f32 %v1343_v0  ;;  %v1050_v53 = vadd.f32 %v1049_v27, %v704_v22  ;;  %v1346_v51 = vadd.f32 1.0, %v3393_v50  ;;  %v3059_v13 = vmul.f32 -1.442695, %v1145_v49 }
 0x165   : > { %v3397_v37 = vpop.eup %3396  ;;  %v4537_v34 = vmul.f32 %v3395_v44, %v521_v48  ;;  %3416 = vpow2.f32 %v3056_v20  ;;  %v1146_v0 = vmax.f32 %v1048_v31, 0.0  ;;  %p3782_p5 = pnand %p3781_p3, %p3775_p0 }
 0x166   : > { %v4539_v47 = vpop.eup %3398  ;;  %v1053_v18 = vpop.f32.mrb[48].mxu0  ;;  %3418 = vpow2.f32 %v3057_v7  ;;  %v1347_v62 = vadd.f32 1.0, %v3397_v37  ;;  %v1147_v48 = vmax.f32 %v1050_v53, 0.0 }
 0x167   : > { %v4541_v60 = vpop.eup %3400  ;;  %v1054_v57 = vadd.f32 %v1053_v18, %v4458_v16  ;;  %v1055_v33 = vpop.f32.mrb[49].mxu0  ;;  %3420 = vrcp.f32 %v1344_v29 }
 0x168   : > { %v4544_v38 = vpop.eup %3402  ;;  %v1056_v2 = vadd.f32 %v1055_v33, %v4458_v16  ;;  %3422 = vrcp.f32 %v1345_v39  ;;  %v3060_v16 = vmul.f32 -1.442695, %v1146_v0  ;;  %v3061_v37 = vmul.f32 -1.442695, %v1147_v48 }
 0x169   : > { %v4547_v12 = vpop.eup %3404  ;;  %3424 = vrcp.f32 %v1346_v51  ;;  %v1148_v21 = vmax.f32 %v1054_v57, 0.0 }
 0x16a   : > { %v4549_v20 = vpop.eup %3406  ;;  %v1059_v50 = vpop.f32.mrb[50].mxu0  ;;  %3426 = vpow2.f32 %v3058_v9  ;;  %v1149_v7 = vmax.f32 %v1056_v2, 0.0 }
 0x16b   : > { %v4551_v22 = vpop.eup %3408  ;;  %v1060_v25 = vadd.f32 %v1059_v50, %v4471_v41  ;;  %v1061_v27 = vpop.f32.mrb[51].mxu0  ;;  %3428 = vrcp.f32 %v1347_v62 }
 0x16c   : > { %v3411_v44 = vpop.eup %3410  ;;  %v1062_v29 = vadd.f32 %v1061_v27, %v4471_v41  ;;  %3430 = vpow2.f32 %v3059_v13 }
 0x16d   : > { %v3413_v31 = vpop.eup %3412  ;;  %3432 = vtanh.f32 %v1148_v21  ;;  %v1150_v49 = vmax.f32 %v1060_v25, 0.0  ;;  %v1348_v33 = vadd.f32 1.0, %v3411_v44 }
 0x16e   : > { %v4555_v39 = vpop.eup %3414  ;;  %v1065_v53 = vpop.f32.mrb[52].mxu0  ;;  %3434 = vtanh.f32 %v1149_v7  ;;  %v1151_v51 = vmax.f32 %v1062_v29, 0.0  ;;  %v1349_v13 = vadd.f32 1.0, %v3413_v31 }
 0x16f   : > { %v1066_v18 = vadd.f32 %v1065_v53, %v4488_v26  ;;  %v1067_v9 = vpop.f32.mrb[53].mxu0  ;;  %v3417_v57 = vpop.eup %3416  ;;  %3436 = vpow2.f32 %v3060_v16 }
 0x170   : > { %v3419_v62 = vpop.eup %3418  ;;  %3438 = vpow2.f32 %v3061_v37  ;;  %v1068_v41 = vadd.f32 %v1067_v9, %v4488_v26  ;;  %v1350_v50 = vadd.f32 1.0, %v3417_v57 }
 0x171   : > { %v1152_v0 = vmax.f32 %v1066_v18, 0.0  ;;  %v4559_v2 = vpop.eup %3420  ;;  %3440 = vtanh.f32 %v1150_v49  ;;  %v1351_v44 = vadd.f32 1.0, %v3419_v62 }
 0x172   : > { %v1071_v48 = vpop.f32.mrb[54].mxu0  ;;  %v4561_v21 = vpop.eup %3422  ;;  %3442 = vtanh.f32 %v1151_v51  ;;  %v1153_v26 = vmax.f32 %v1068_v41, 0.0 }
 0x173   : > { %v1072_v7 = vadd.f32 %v1071_v48, %v4502_v15  ;;  %v1073_v25 = vpop.f32.mrb[55].mxu0  ;;  %v4564_v27 = vpop.eup %3424  ;;  %3444 = vrcp.f32 %v1348_v33 }
 0x174   : > { %v1074_v16 = vadd.f32 %v1073_v25, %v4502_v15  ;;  %v4567_v29 = vpop.eup %3426  ;;  %3446 = vtanh.f32 %v1152_v0 }
 0x175   : > { %v4569_v31 = vpop.eup %3428  ;;  %3448 = vrcp.f32 %v1349_v13  ;;  %v1154_v37 = vmax.f32 %v1072_v7, 0.0 }
 0x176   : > { %v1077_v49 = vpop.f32.mrb[56].mxu0  ;;  %v4571_v53 = vpop.eup %3430  ;;  %3450 = vrcp.f32 %v1350_v50  ;;  %v1155_v51 = vmax.f32 %v1074_v16, 0.0 }
 0x177   : > { %v1078_v18 = vadd.f32 %v1077_v49, %v4516_v59  ;;  %v1079_v9 = vpop.f32.mrb[57].mxu0  ;;  %v3433_v57 = vpop.eup %3432  ;;  %3452 = vrcp.f32 %v1351_v44 }
 0x178   : > { %v1080_v15 = vadd.f32 %v1079_v9, %v4516_v59  ;;  %v3435_v33 = vpop.eup %3434  ;;  %v1484_v62 = vmul.f32 %v3433_v57, %v4416_v54  ;;  %3454 = vtanh.f32 %v1153_v26 }
 0x179   : > { %v1156_v0 = vmax.f32 %v1078_v18, 0.0  ;;  %v4576_v41 = vpop.eup %3436  ;;  %v1485_v13 = vmul.f32 %v3435_v33, %v4419_v63  ;;  %3456 = vtanh.f32 %v1154_v37 }
 0x17a   : > { %v1157_v48 = vmax.f32 %v1080_v15, 0.0  ;;  %v1083_v50 = vpop.f32.mrb[58].mxu0  ;;  %v4579_v7 = vpop.eup %3438  ;;  %v4582_v25 = vadd.f32 %v1484_v62, %v4476_v56  ;;  %3458 = vtanh.f32 %v1155_v51 }
 0x17b   : > { %v1084_v59 = vadd.f32 %v1083_v50, %v4524_v32  ;;  %v1085_v44 = vpop.f32.mrb[59].mxu0  ;;  %v3441_v16 = vpop.eup %3440  ;;  %v4586_v54 = vadd.f32 %v1485_v13, %v4479_v61  ;;  %3460 = vtanh.f32 %v1156_v0 }
 0x17c   : > { %v1086_v26 = vadd.f32 %v1085_v44, %v4524_v32  ;;  %v3443_v63 = vpop.eup %3442  ;;  %v1486_v37 = vmul.f32 %v3441_v16, %v4422_v4  ;;  %3462 = vtanh.f32 %v1157_v48  ;;  %v739_v56 = vpop.permute.xlu0 %738 }
 0x17d   : > { %v1158_v49 = vmax.f32 %v1084_v59, 0.0  ;;  %v4590_v18 = vpop.eup %3444  ;;  %v1487_v51 = vmul.f32 %v3443_v63, %v4424_v10  ;;  %3464 = vtanh.f32 %v4586_v54 }
 0x17e   : > { %v1159_v9 = vmax.f32 %v1086_v26, 0.0  ;;  %v1089_v57 = vpop.f32.mrb[60].mxu0  ;;  %v3447_v15 = vpop.eup %3446  ;;  %v4595_v61 = vadd.f32 %v1486_v37, %v4484_v19 }
 0x17f   : > { %3466 = vtanh.f32 %v1158_v49  ;;  %v1090_v32 = vadd.f32 %v1089_v57, %v739_v56  ;;  %v1091_v33 = vpop.f32.mrb[61].mxu0  ;;  %v4597_v62 = vpop.eup %3448  ;;  %v4600_v4 = vadd.f32 %v1487_v51, %v4492_v35  ;;  %v1488_v0 = vmul.f32 %v3447_v15, %v4427_v14 }
 0x180   : > { %3468 = vtanh.f32 %v1159_v9  ;;  %v1092_v10 = vadd.f32 %v1091_v33, %v739_v56  ;;  %v4603_v13 = vpop.eup %3450  ;;  %v744_v19 = vpop.permute.xlu1 %743 }
 0x181   : > { %v1160_v48 = vmax.f32 %v1090_v32, 0.0  ;;  %3470 = vtanh.f32 %v4582_v25  ;;  %v4606_v50 = vpop.eup %3452  ;;  %v4609_v59 = vadd.f32 %v1488_v0, %v4494_v42 }
 0x182   : > { %v1161_v44 = vmax.f32 %v1092_v10, 0.0  ;;  %v1095_v16 = vpop.f32.mrb[62].mxu0  ;;  %3472 = vtanh.f32 %v4600_v4  ;;  %v3455_v35 = vpop.eup %3454 }
 0x183   : > { %3474 = vtanh.f32 %v1160_v48  ;;  %v1096_v14 = vadd.f32 %v1095_v16, %v744_v19  ;;  %v1097_v26 = vpop.f32.mrb[63].mxu0  ;;  %v3457_v63 = vpop.eup %3456  ;;  %v1489_v37 = vmul.f32 %v3455_v35, %v4430_v24 }
 0x184   : > { %3476 = vtanh.f32 %v4609_v59  ;;  %v3459_v49 = vpop.eup %3458  ;;  %v1490_v56 = vmul.f32 %v3457_v63, %v4433_v28  ;;  %v1098_v42 = vadd.f32 %v1097_v26, %v744_v19  ;;  %v1352_v63 = vadd.f32 1.0, %v4567_v29 }
 0x185   : > { %3478 = vtanh.f32 %v1161_v44  ;;  %v1162_v51 = vmax.f32 %v1096_v14, 0.0  ;;  %v3461_v9 = vpop.eup %3460  ;;  %v4616_v57 = vadd.f32 %v1489_v37, %v4496_v46  ;;  %v1491_v15 = vmul.f32 %v3459_v49, %v4438_v36 }
 0x186   : > { %3480 = vtanh.f32 %v4595_v61  ;;  %v3463_v32 = vpop.eup %3462  ;;  %v4621_v33 = vadd.f32 %v1490_v56, %v4504_v8  ;;  %v1492_v24 = vmul.f32 %v3461_v9, %v4440_v40  ;;  %v1163_v48 = vmax.f32 %v1098_v42, 0.0 }
 0x187   : > { %3482 = vtanh.f32 %v1162_v51  ;;  %v3465_v0 = vpop.eup %3464  ;;  %v4626_v28 = vadd.f32 %v1491_v15, %v4506_v17  ;;  %v1493_v46 = vmul.f32 %v3463_v32, %v4451_v58  ;;  %v1353_v32 = vadd.f32 1.0, %v4571_v53 }
 0x188   : > { %3484 = vtanh.f32 %v4616_v57  ;;  %v4631_v36 = vadd.f32 %v1492_v24, %v4511_v43 }
 0x189   : > { %v3467_v10 = vpop.eup %3466  ;;  %3486 = vtanh.f32 %v4621_v33  ;;  %v4635_v40 = vadd.f32 %v1493_v46, %v4514_v52  ;;  %v1533_v52 = vmul.f32 %v3465_v0, %v4549_v20 }
 0x18a   : > { %v3469_v8 = vpop.eup %3468  ;;  %3488 = vtanh.f32 %v4626_v28  ;;  %v1494_v19 = vmul.f32 %v3467_v10, %v4454_v1 }
 0x18b   : > { %v3471_v44 = vpop.eup %3470  ;;  %3490 = vtanh.f32 %v4631_v36  ;;  %v1495_v58 = vmul.f32 %v3469_v8, %v4466_v23 }
 0x18c   : > { %v3473_v17 = vpop.eup %3472  ;;  %3492 = vtanh.f32 %v4635_v40  ;;  %v4642_v43 = vadd.f32 %v1494_v19, %v4519_v3  ;;  %v1532_v56 = vmul.f32 %v3471_v44, %v4547_v12 }
 0x18d   : > { %v3475_v16 = vpop.eup %3474  ;;  %v4645_v35 = vadd.f32 %v1495_v58, %v4526_v55  ;;  %3494 = vtanh.f32 %v1163_v48  ;;  %v1535_v1 = vmul.f32 %v3473_v17, %v4555_v39  ;;  %v1354_v39 = vadd.f32 1.0, %v4576_v41 }
 0x18e   : > { %v3477_v14 = vpop.eup %3476  ;;  %3496 = vtanh.f32 %v4642_v43  ;;  %v1496_v23 = vmul.f32 %v3475_v16, %v4468_v30 }
 0x18f   : > { %v3479_v26 = vpop.eup %3478  ;;  %3498 = vtanh.f32 %v4645_v35  ;;  %v3168_v3 = vpack.c.bf16 %v1535_v1, %v1533_v52  ;;  %v1536_v41 = vmul.f32 %v3477_v14, %v4559_v2 }
 0x190   : > { %v3481_v37 = vpop.eup %3480  ;;  %v4654_v55 = vadd.f32 %v1496_v23, %v4528_v45  ;;  %v1497_v49 = vmul.f32 %v3479_v26, %v4539_v47  ;;  %3500 = vrcp.f32 %v1352_v63  ;;  %v1548_v63 = vld [vmem:[%s5200_s5] sm:$0xff] }
 0x191   : > { %v3483_v20 = vpop.eup %3482  ;;  %3169 = vmatprep.subr.bf16.mxu1 %v3168_v3  ;;  %v1534_v30 = vmul.f32 %v3481_v37, %v4551_v22  ;;  %v1549_v3 = vld [vmem:[%s5200_s5 + $0x8] sm:$0xff]  ;;  %v1550_v37 = vld [vmem:[%s5200_s5 + $0x10] sm:$0xff] }
 0x192   : > { %v3485_v51 = vpop.eup %3484  ;;  %v4661_v29 = vadd.f32 %v1497_v49, %v4532_v11  ;;  %v1498_v42 = vmul.f32 %v3483_v20, %v4541_v60  ;;  %3502 = vtanh.f32 %v4654_v55  ;;  %v1551_v49 = vld [vmem:[%s5200_s5 + $0x18] sm:$0xff]  ;;  %v1552_v20 = vld [vmem:[%s5200_s5 + $0x20] sm:$0xff] }
 0x193   : > { %v3487_v9 = vpop.eup %3486  ;;  %v3170_v45 = vpack.c.bf16 %v1534_v30, %v1532_v56  ;;  %3504 = vrcp.f32 %v1354_v39  ;;  %v1537_v11 = vmul.f32 %v3485_v51, %v4561_v21  ;;  %v1553_v39 = vld [vmem:[%s5200_s5 + $0x28] sm:$0xff]  ;;  %v1554_v56 = vld [vmem:[%s5200_s5 + $0x30] sm:$0xff]  ;;  %v1555_v30 = vld [vmem:[%s5200_s5 + $0x38] sm:$0xff] }
 0x194   : > { %5214 = vst [vmem:[#allocation6_spill] sm:$0xff] %v4661_v29  ;;  %v3489_v15 = vpop.eup %3488  ;;  %v4666_v47 = vadd.f32 %v1498_v42, %v4534_v5  ;;  %v1538_v12 = vmul.f32 %v3487_v9, %v4564_v27  ;;  %v1355_v5 = vadd.f32 1.0, %v4579_v7  ;;  %v1556_v51 = vld [vmem:[%s5200_s5 + $0x40] sm:$0xff]  ;;  %v1557_v42 = vld [vmem:[%s5200_s5 + $0x48] sm:$0xff]  ;;  %v1558_v9 = vld [vmem:[%s5200_s5 + $0x50] sm:$0xff] }
 0x195   : > { %v3491_v22 = vpop.eup %3490  ;;  %3171 = vmatpush1.bf16.msra.mxu1 %v3170_v45  ;;  %v1539_v60 = vmul.f32 %v3489_v15, %v4569_v31  ;;  %v1559_v45 = vld [vmem:[%s5200_s5 + $0x58] sm:$0xff]  ;;  %v1560_v15 = vld [vmem:[%s5200_s5 + $0x60] sm:$0xff] }
 0x196   : > { %5215 = vst [vmem:[#allocation7_spill] sm:$0xff] %v4666_v47  ;;  %v3493_v24 = vpop.eup %3492  ;;  %3506 = vtanh.f32 %v4666_v47  ;;  %v3174_v0 = vpack.c.bf16 %v1538_v12, %v1536_v41  ;;  %v1540_v53 = vmul.f32 %v3491_v22, %v4590_v18  ;;  %v1561_v41 = vld [vmem:[%s5200_s5 + $0x68] sm:$0xff]  ;;  %v1562_v12 = vld [vmem:[%s5200_s5 + $0x70] sm:$0xff]  ;;  %v1563_v22 = vld [vmem:[%s5200_s5 + $0x78] sm:$0xff] }
 0x197   : > { %v3495_v46 = vpop.eup %3494  ;;  %v3172_v10 = vpack.c.bf16 %v1539_v60, %v1537_v11  ;;  %3508 = vrcp.f32 %v1353_v32  ;;  %v1541_v8 = vmul.f32 %v3493_v24, %v4597_v62  ;;  %v1564_v32 = vld [vmem:[%s5200_s5 + $0x80] sm:$0xff]  ;;  %v1565_v11 = vld [vmem:[%s5200_s5 + $0x88] sm:$0xff]  ;;  %v1566_v60 = vld [vmem:[%s5200_s5 + $0x90] sm:$0xff] }
 0x198   : > { %v3497_v2 = vpop.eup %3496  ;;  %v1499_v27 = vmul.f32 %v3495_v46, %v4544_v38  ;;  %3510 = vtanh.f32 %v4661_v29  ;;  %v1567_v24 = vld [vmem:[%s5200_s5 + $0x98] sm:$0xff]  ;;  %v1569_v46 = vld [vmem:[%s5200_s5 + $0xa8] sm:$0xff] }
 0x199   : > { %v3499_v48 = vpop.eup %3498  ;;  %3173 = vmatprep.subr.bf16.mxu1 %v3172_v10  ;;  %v1542_v21 = vmul.f32 %v3497_v2, %v4603_v13  ;;  %3512 = vrcp.f32 %v1355_v5  ;;  %v1570_v5 = vld [vmem:[%s5200_s5 + $0xb0] sm:$0xff]  ;;  %v1571_v10 = vld [vmem:[%s5200_s5 + $0xb8] sm:$0xff]  ;;  %v1572_v2 = vld [vmem:[%s5200_s5 + $0xc0] sm:$0xff] }
 0x19a   : > { %v4680_v31 = vadd.f32 %v1499_v27, %v4537_v34  ;;  %3175 = vmatpush1.bf16.msra.mxu1 %v3174_v0  ;;  %v1543_v7 = vmul.f32 %v3499_v48, %v4606_v50  ;;  %v3501_v44 = vpop.eup %3500  ;;  %v1568_v0 = vld [vmem:[%s5200_s5 + $0xa0] sm:$0xff]  ;;  %v1573_v27 = vld [vmem:[%s5200_s5 + $0xc8] sm:$0xff]  ;;  %v1574_v48 = vld [vmem:[%s5200_s5 + $0xd0] sm:$0xff] }
 0x19b   : > { %v3178_v19 = vpack.c.bf16 %v1542_v21, %v1540_v53  ;;  %v1575_v53 = vld [vmem:[%s5200_s5 + $0xd8] sm:$0xff]  ;;  %v1576_v21 = vld [vmem:[%s5200_s5 + $0xe0] sm:$0xff] }
 0x19c   : > { %5216 = vst [vmem:[#allocation8_spill] sm:$0xff] %v4680_v31  ;;  %3514 = vtanh.f32 %v4680_v31  ;;  %v3176_v38 = vpack.c.bf16 %v1543_v7, %v1541_v8  ;;  %v3503_v58 = vpop.eup %3502  ;;  %v1577_v8 = vld [vmem:[%s5200_s5 + $0xe8] sm:$0xff]  ;;  %v1578_v7 = vld [vmem:[%s5200_s5 + $0xf0] sm:$0xff] }
 0x19d   : > { %v3505_v18 = vpop.eup %3504  ;;  %v1544_v17 = vmul.f32 %v3503_v58, %v3501_v44  ;;  %v1620_v44 = vpop.permute.xlu1 %1619 }
 0x19e   : > { %3177 = vmatprep.subr.bf16.mxu1 %v3176_v38  ;;  %v1615_v38 = vpop.permute.xlu0 %1614 }
 0x19f   : > { %3179 = vmatpush1.bf16.msra.mxu1 %v3178_v19  ;;  %v1579_v19 = vld [vmem:[%s5200_s5 + $0xf8] sm:$0xff] }
 0x1a0   : > { %v3507_v13 = vpop.eup %3506 }
 0x1a1   : > { %v1546_v16 = vmul.f32 %v3507_v13, %v3505_v18  ;;  %v3509_v34 = vpop.eup %3508  ;;  %v4846_v18 = vpop.permute.xlu1 %1659 }
 0x1a2   : > { %v3511_v1 = vpop.eup %3510  ;;  %v4844_v58 = vpop.permute.xlu0 %1654 }
 0x1a3   : > { %v3182_v52 = vpack.c.bf16 %v1546_v16, %v1544_v17  ;;  %v3513_v14 = vpop.eup %3512  ;;  %v1545_v23 = vmul.f32 %v3511_v1, %v3509_v34 }
 0x1a6   : > { %v3515_v62 = vpop.eup %3514  ;;  %v1625_v13 = vpop.permute.xlu0 %1624 }
 0x1a7   : > { %v1547_v50 = vmul.f32 %v3515_v62, %v3513_v14  ;;  %v1630_v14 = vpop.permute.xlu1 %1629 }
 0x1a9   : > { %v3180_v26 = vpack.c.bf16 %v1547_v50, %v1545_v23 }
 0x1ab   : > { %3181 = vmatprep.subr.bf16.mxu1 %v3180_v26 }
 0x1ac   : > { %3183 = vmatpush1.bf16.msra.mxu1 %v3182_v52 }
 0x1af   : > { %3062 = vmatmul.mubr.msk.f32.vlgmr.msra.gmra.mrb[0].mxu1 %vm746_vm0, %v1548_v63  ;;  %v4848_v63 = vpop.permute.xlu0 %1664 }
 0x1b0   : > { %1938 = vmatprep.mubr.f32.mxu1 %v3853_v6 }
 0x1b3   : > { %3063 = vmatmul.mubr.msk.f32.gmra.mrb[2].mxu1 %vm746_vm0, %v1549_v3 }
 0x1b4   : > { %1944 = vmatprep.mubr.f32.mxu1 %v3853_v6 }
 0x1b7   : > { %3064 = vmatmul.mubr.msk.f32.gmra.mrb[4].mxu1 %vm746_vm0, %v1550_v37 }
 0x1b8   : > { %1950 = vmatprep.mubr.f32.mxu1 %v3853_v6 }
 0x1bb   : > { %3065 = vmatmul.mubr.msk.f32.gmra.mrb[6].mxu1 %vm746_vm0, %v1551_v49 }
 0x1bc   : > { %1956 = vmatprep.mubr.f32.mxu1 %v3853_v6 }
 0x1bf   : > { %3066 = vmatmul.mubr.msk.f32.gmra.mrb[8].mxu1 %vm746_vm0, %v1552_v20 }
 0x1c0   : > { %1962 = vmatprep.mubr.f32.mxu1 %v3853_v6 }
 0x1c3   : > { %3067 = vmatmul.mubr.msk.f32.gmra.mrb[10].mxu1 %vm746_vm0, %v1553_v39 }
 0x1c4   : > { %1968 = vmatprep.mubr.f32.mxu1 %v3853_v6 }
 0x1c7   : > { %3068 = vmatmul.mubr.msk.f32.gmra.mrb[12].mxu1 %vm746_vm0, %v1554_v56 }
 0x1c8   : > { %1974 = vmatprep.mubr.f32.mxu1 %v3853_v6 }
 0x1cb   : > { %3069 = vmatmul.mubr.msk.f32.gmra.mrb[14].mxu1 %vm746_vm0, %v1555_v30 }
 0x1cc   : > { %1980 = vmatprep.mubr.f32.mxu1 %v3853_v6 }
 0x1cf   : > { %3070 = vmatmul.mubr.msk.f32.gmra.mrb[16].mxu1 %vm746_vm0, %v1556_v51 }
 0x1d0   : > { %1986 = vmatprep.mubr.f32.mxu1 %v3853_v6 }
 0x1d3   : > { %3071 = vmatmul.mubr.msk.f32.gmra.mrb[18].mxu1 %vm746_vm0, %v1557_v42  ;;  %v4850_v42 = vpop.permute.xlu1 %1669 }
 0x1d4   : > { %1992 = vmatprep.mubr.f32.mxu1 %v3853_v6 }
 0x1d7   : > { %3072 = vmatmul.mubr.msk.f32.gmra.mrb[20].mxu1 %vm746_vm0, %v1558_v9 }
 0x1d8   : > { %1998 = vmatprep.mubr.f32.mxu1 %v3853_v6 }
 0x1db   : > { %3073 = vmatmul.mubr.msk.f32.gmra.mrb[22].mxu1 %vm746_vm0, %v1559_v45 }
 0x1dc   : > { %2004 = vmatprep.mubr.f32.mxu1 %v3853_v6 }
 0x1df   : > { %3074 = vmatmul.mubr.msk.f32.gmra.mrb[24].mxu1 %vm746_vm0, %v1560_v15 }
 0x1e0   : > { %2010 = vmatprep.mubr.f32.mxu1 %v3853_v6 }
 0x1e3   : > { %3075 = vmatmul.mubr.msk.f32.gmra.mrb[26].mxu1 %vm746_vm0, %v1561_v41  ;;  %v1635_v41 = vpop.permute.xlu0 %1634 }
 0x1e4   : > { %2016 = vmatprep.mubr.f32.mxu1 %v3853_v6 }
 0x1e7   : > { %3076 = vmatmul.mubr.msk.f32.gmra.mrb[28].mxu1 %vm746_vm0, %v1562_v12 }
 0x1e8   : > { %2022 = vmatprep.mubr.f32.mxu1 %v3853_v6 }
 0x1eb   : > { %3077 = vmatmul.mubr.msk.f32.gmra.mrb[30].mxu1 %vm746_vm0, %v1563_v22 }
 0x1ec   : > { %2028 = vmatprep.mubr.f32.mxu1 %v3853_v6 }
 0x1ef   : > { %3078 = vmatmul.mubr.msk.f32.gmra.mrb[32].mxu1 %vm746_vm0, %v1564_v32 }
 0x1f0   : > { %2034 = vmatprep.mubr.f32.mxu1 %v3853_v6 }
 0x1f3   : > { %3079 = vmatmul.mubr.msk.f32.gmra.mrb[34].mxu1 %vm746_vm0, %v1565_v11 }
 0x1f4   : > { %2040 = vmatprep.mubr.f32.mxu1 %v3853_v6 }
 0x1f7   : > { %3080 = vmatmul.mubr.msk.f32.gmra.mrb[36].mxu1 %vm746_vm0, %v1566_v60 }
 0x1f8   : > { %2046 = vmatprep.mubr.f32.mxu1 %v3853_v6 }
 0x1fb   : > { %3081 = vmatmul.mubr.msk.f32.gmra.mrb[38].mxu1 %vm746_vm0, %v1567_v24 }
 0x1fc   : > { %2052 = vmatprep.mubr.f32.mxu1 %v3853_v6 }
 0x1ff   : > { %3082 = vmatmul.mubr.msk.f32.gmra.mrb[40].mxu1 %vm746_vm0, %v1568_v0 }
 0x200   : > { %2058 = vmatprep.mubr.f32.mxu1 %v3853_v6 }
 0x203   : > { %3083 = vmatmul.mubr.msk.f32.gmra.mrb[42].mxu1 %vm746_vm0, %v1569_v46 }
 0x204   : > { %2064 = vmatprep.mubr.f32.mxu1 %v3853_v6 }
 0x207   : > { %3084 = vmatmul.mubr.msk.f32.gmra.mrb[44].mxu1 %vm746_vm0, %v1570_v5  ;;  %v1640_v5 = vpop.permute.xlu1 %1639 }
 0x208   : > { %2070 = vmatprep.mubr.f32.mxu1 %v3853_v6 }
 0x20b   : > { %3085 = vmatmul.mubr.msk.f32.gmra.mrb[46].mxu1 %vm746_vm0, %v1571_v10 }
 0x20c   : > { %2076 = vmatprep.mubr.f32.mxu1 %v3853_v6 }
 0x20f   : > { %3086 = vmatmul.mubr.msk.f32.gmra.mrb[48].mxu1 %vm746_vm0, %v1572_v2 }
 0x210   : > { %2082 = vmatprep.mubr.f32.mxu1 %v3853_v6 }
 0x213   : > { %3087 = vmatmul.mubr.msk.f32.gmra.mrb[50].mxu1 %vm746_vm0, %v1573_v27 }
 0x214   : > { %2088 = vmatprep.mubr.f32.mxu1 %v3853_v6 }
 0x217   : > { %3088 = vmatmul.mubr.msk.f32.gmra.mrb[52].mxu1 %vm746_vm0, %v1574_v48 }
 0x218   : > { %2094 = vmatprep.mubr.f32.mxu1 %v3853_v6 }
 0x21b   : > { %3089 = vmatmul.mubr.msk.f32.gmra.mrb[54].mxu1 %vm746_vm0, %v1575_v53 }
 0x21c   : > { %2100 = vmatprep.mubr.f32.mxu1 %v3853_v6 }
 0x21f   : > { %3090 = vmatmul.mubr.msk.f32.gmra.mrb[56].mxu1 %vm746_vm0, %v1576_v21 }
 0x220   : > { %2106 = vmatprep.mubr.f32.mxu1 %v3853_v6 }
 0x223   : > { %3091 = vmatmul.mubr.msk.f32.gmra.mrb[58].mxu1 %vm746_vm0, %v1577_v8  ;;  %v4852_v8 = vpop.permute.xlu0 %1674 }
 0x224   : > { %2112 = vmatprep.mubr.f32.mxu1 %v3853_v6 }
 0x227   : > { %3092 = vmatmul.mubr.msk.f32.gmra.mrb[60].mxu1 %vm746_vm0, %v1578_v7 }
 0x228   : > { %2118 = vmatprep.mubr.f32.mxu1 %v3853_v6 }
 0x22b   : > { %3093 = vmatmul.mubr.msk.f32.gmra.mrb[62].mxu1 %vm746_vm0, %v1579_v19 }
 0x282   : > { %v1934_v17 = vpop.f32.mrb[0].mxu1 }
 0x283   : > { %v1935_v16 = vadd.f32 %v1934_v17, %v1615_v38  ;;  %v1936_v34 = vpop.f32.mrb[1].mxu1 }
 0x284   : > { %v1937_v52 = vadd.f32 %v1936_v34, %v1615_v38 }
 0x285   : > { %v2125_v1 = vmax.f32 %v1935_v16, 0.0 }
 0x286   : > { %v2126_v6 = vmax.f32 %v1937_v52, 0.0  ;;  %v1940_v62 = vpop.f32.mrb[2].mxu1 }
 0x287   : > { %v3094_v23 = vmul.f32 -1.442695, %v2125_v1  ;;  %v1941_v50 = vadd.f32 %v1940_v62, %v1620_v44  ;;  %v1942_v26 = vpop.f32.mrb[3].mxu1  ;;  %v4854_v1 = vpop.permute.xlu1 %1679 }
 0x288   : > { %v1943_v3 = vadd.f32 %v1942_v26, %v1620_v44  ;;  %v3095_v37 = vmul.f32 -1.442695, %v2126_v6 }
 0x289   : > { %v2127_v49 = vmax.f32 %v1941_v50, 0.0  ;;  %3516 = vpow2.f32 %v3094_v23 }
 0x28a   : > { %v2128_v20 = vmax.f32 %v1943_v3, 0.0  ;;  %v1946_v39 = vpop.f32.mrb[4].mxu1  ;;  %3518 = vpow2.f32 %v3095_v37  ;;  %v1645_v3 = vpop.permute.xlu0 %1644 }
 0x28b   : > { %v3096_v56 = vmul.f32 -1.442695, %v2127_v49  ;;  %v1947_v30 = vadd.f32 %v1946_v39, %v1625_v13  ;;  %v1948_v51 = vpop.f32.mrb[5].mxu1 }
 0x28c   : > { %v3097_v9 = vmul.f32 -1.442695, %v2128_v20  ;;  %v1949_v45 = vadd.f32 %v1948_v51, %v1625_v13 }
 0x28d   : > { %v2129_v15 = vmax.f32 %v1947_v30, 0.0  ;;  %3520 = vpow2.f32 %v3096_v56 }
 0x28e   : > { %v2130_v12 = vmax.f32 %v1949_v45, 0.0  ;;  %v1952_v22 = vpop.f32.mrb[6].mxu1  ;;  %3522 = vpow2.f32 %v3097_v9 }
 0x28f   : > { %v3098_v32 = vmul.f32 -1.442695, %v2129_v15  ;;  %v1953_v11 = vadd.f32 %v1952_v22, %v1630_v14  ;;  %v1954_v60 = vpop.f32.mrb[7].mxu1  ;;  %v1650_v22 = vpop.permute.xlu1 %1649 }
 0x290   : > { %v3099_v24 = vmul.f32 -1.442695, %v2130_v12  ;;  %v1955_v0 = vadd.f32 %v1954_v60, %v1630_v14 }
 0x291   : > { %3524 = vpow2.f32 %v3098_v32  ;;  %v2131_v46 = vmax.f32 %v1953_v11, 0.0 }
 0x292   : > { %v2132_v10 = vmax.f32 %v1955_v0, 0.0  ;;  %v1958_v2 = vpop.f32.mrb[8].mxu1  ;;  %3526 = vpow2.f32 %v3099_v24 }
 0x293   : > { %v3100_v27 = vmul.f32 -1.442695, %v2131_v46  ;;  %v1959_v48 = vadd.f32 %v1958_v2, %v1635_v41  ;;  %v1960_v53 = vpop.f32.mrb[9].mxu1  ;;  %v3517_v21 = vpop.eup %3516 }
 0x294   : > { %v1961_v7 = vadd.f32 %v1960_v53, %v1635_v41  ;;  %v3101_v19 = vmul.f32 -1.442695, %v2132_v10  ;;  %v3519_v17 = vpop.eup %3518  ;;  %v2333_v16 = vadd.f32 1.0, %v3517_v21 }
 0x295   : > { %v2133_v38 = vmax.f32 %v1959_v48, 0.0  ;;  %3528 = vpow2.f32 %v3100_v27  ;;  %v2334_v37 = vadd.f32 1.0, %v3519_v17 }
 0x296   : > { %v2134_v44 = vmax.f32 %v1961_v7, 0.0  ;;  %v1964_v13 = vpop.f32.mrb[10].mxu1  ;;  %3530 = vpow2.f32 %v3101_v19 }
 0x297   : > { %v1965_v34 = vadd.f32 %v1964_v13, %v1640_v5  ;;  %v1966_v52 = vpop.f32.mrb[11].mxu1  ;;  %v3102_v14 = vmul.f32 -1.442695, %v2133_v38  ;;  %v3521_v62 = vpop.eup %3520  ;;  %3532 = vrcp.f32 %v2333_v16 }
 0x298   : > { %v1967_v6 = vadd.f32 %v1966_v52, %v1640_v5  ;;  %v3103_v23 = vmul.f32 -1.442695, %v2134_v44  ;;  %v3523_v26 = vpop.eup %3522  ;;  %v2335_v9 = vadd.f32 1.0, %v3521_v62 }
 0x299   : > { %v2135_v50 = vmax.f32 %v1965_v34, 0.0  ;;  %3534 = vpow2.f32 %v3102_v14  ;;  %v2336_v15 = vadd.f32 1.0, %v3523_v26 }
 0x29a   : > { %v1970_v49 = vpop.f32.mrb[12].mxu1  ;;  %v2136_v56 = vmax.f32 %v1967_v6, 0.0  ;;  %3536 = vpow2.f32 %v3103_v23 }
 0x29b   : > { %v3525_v20 = vpop.eup %3524  ;;  %v3104_v39 = vmul.f32 -1.442695, %v2135_v50  ;;  %v1971_v30 = vadd.f32 %v1970_v49, %v1645_v3  ;;  %v1972_v51 = vpop.f32.mrb[13].mxu1  ;;  %3538 = vrcp.f32 %v2334_v37 }
 0x29c   : > { %v1973_v45 = vadd.f32 %v1972_v51, %v1645_v3  ;;  %v3527_v12 = vpop.eup %3526  ;;  %v2337_v32 = vadd.f32 1.0, %v3525_v20  ;;  %v3105_v24 = vmul.f32 -1.442695, %v2136_v56 }
 0x29d   : > { %v2137_v41 = vmax.f32 %v1971_v30, 0.0  ;;  %3540 = vpow2.f32 %v3104_v39  ;;  %v2338_v27 = vadd.f32 1.0, %v3527_v12 }
 0x29e   : > { %v2138_v11 = vmax.f32 %v1973_v45, 0.0  ;;  %v1976_v60 = vpop.f32.mrb[14].mxu1  ;;  %3542 = vrcp.f32 %v2335_v9 }
 0x29f   : > { %v1977_v0 = vadd.f32 %v1976_v60, %v1650_v22  ;;  %v1978_v46 = vpop.f32.mrb[15].mxu1  ;;  %v3106_v5 = vmul.f32 -1.442695, %v2137_v41  ;;  %v3529_v2 = vpop.eup %3528  ;;  %3544 = vrcp.f32 %v2336_v15 }
 0x2a0   : > { %v1979_v10 = vadd.f32 %v1978_v46, %v1650_v22  ;;  %3546 = vrcp.f32 %v2337_v32  ;;  %v3107_v53 = vmul.f32 -1.442695, %v2138_v11  ;;  %v3531_v19 = vpop.eup %3530  ;;  %v2339_v17 = vadd.f32 1.0, %v3529_v2 }
 0x2a1   : > { %v2139_v48 = vmax.f32 %v1977_v0, 0.0  ;;  %3548 = vpow2.f32 %v3105_v24  ;;  %v4858_v34 = vpop.eup %3532  ;;  %v2340_v62 = vadd.f32 1.0, %v3531_v19 }
 0x2a2   : > { %v2140_v21 = vmax.f32 %v1979_v10, 0.0  ;;  %v1982_v7 = vpop.f32.mrb[16].mxu1  ;;  %3550 = vpow2.f32 %v3106_v5 }
 0x2a3   : > { %v3108_v38 = vmul.f32 -1.442695, %v2139_v48  ;;  %v1983_v44 = vadd.f32 %v1982_v7, %v4844_v58  ;;  %v1984_v13 = vpop.f32.mrb[17].mxu1  ;;  %3552 = vrcp.f32 %v2338_v27  ;;  %v3535_v6 = vpop.eup %3534 }
 0x2a4   : > { %v1985_v16 = vadd.f32 %v1984_v13, %v4844_v58  ;;  %v3109_v52 = vmul.f32 -1.442695, %v2140_v21  ;;  %3554 = vpow2.f32 %v3107_v53  ;;  %v3537_v26 = vpop.eup %3536  ;;  %v2341_v30 = vadd.f32 1.0, %v3535_v6 }
 0x2a5   : > { %v2141_v14 = vmax.f32 %v1983_v44, 0.0  ;;  %3556 = vpow2.f32 %v3108_v38  ;;  %v4861_v20 = vpop.eup %3538  ;;  %v2342_v45 = vadd.f32 1.0, %v3537_v26  ;;  %v1685_v38 = vpop.permute.xlu0 %1684 }
 0x2a6   : > { %v2142_v23 = vmax.f32 %v1985_v16, 0.0  ;;  %v1988_v50 = vpop.f32.mrb[18].mxu1  ;;  %3558 = vrcp.f32 %v2339_v17 }
 0x2a7   : > { %v3110_v3 = vmul.f32 -1.442695, %v2141_v14  ;;  %v1989_v37 = vadd.f32 %v1988_v50, %v4846_v18  ;;  %v1990_v49 = vpop.f32.mrb[19].mxu1  ;;  %v3541_v56 = vpop.eup %3540  ;;  %3560 = vpow2.f32 %v3109_v52 }
 0x2a8   : > { %v3111_v58 = vmul.f32 -1.442695, %v2142_v23  ;;  %v1991_v39 = vadd.f32 %v1990_v49, %v4846_v18  ;;  %v4864_v9 = vpop.eup %3542  ;;  %3562 = vrcp.f32 %v2340_v62  ;;  %v2343_v18 = vadd.f32 1.0, %v3541_v56 }
 0x2a9   : > { %v2143_v51 = vmax.f32 %v1989_v37, 0.0  ;;  %v4866_v12 = vpop.eup %3544  ;;  %3564 = vpow2.f32 %v3110_v3 }
 0x2aa   : > { %v2144_v15 = vmax.f32 %v1991_v39, 0.0  ;;  %v1994_v41 = vpop.f32.mrb[20].mxu1  ;;  %v4869_v60 = vpop.eup %3546  ;;  %3566 = vpow2.f32 %v3111_v58 }
 0x2ab   : > { %v3112_v22 = vmul.f32 -1.442695, %v2143_v51  ;;  %v1995_v32 = vadd.f32 %v1994_v41, %v4848_v63  ;;  %v1996_v11 = vpop.f32.mrb[21].mxu1  ;;  %v3549_v0 = vpop.eup %3548  ;;  %3568 = vrcp.f32 %v2341_v30 }
 0x2ac   : > { %v1997_v24 = vadd.f32 %v1996_v11, %v4848_v63  ;;  %v3113_v46 = vmul.f32 -1.442695, %v2144_v15  ;;  %v3551_v10 = vpop.eup %3550  ;;  %3570 = vrcp.f32 %v2342_v45  ;;  %v2344_v44 = vadd.f32 1.0, %v3549_v0  ;;  %v1690_v58 = vpop.permute.xlu1 %1689 }
 0x2ad   : > { %v2145_v5 = vmax.f32 %v1995_v32, 0.0  ;;  %v4872_v48 = vpop.eup %3552  ;;  %3572 = vpow2.f32 %v3112_v22  ;;  %v2345_v16 = vadd.f32 1.0, %v3551_v10  ;;  %v4882_v15 = vpop.permute.xlu0 %1694 }
 0x2ae   : > { %v2146_v2 = vmax.f32 %v1997_v24, 0.0  ;;  %v2000_v27 = vpop.f32.mrb[22].mxu1  ;;  %v3555_v19 = vpop.eup %3554  ;;  %3574 = vrcp.f32 %v2343_v18 }
 0x2af   : > { %v3114_v53 = vmul.f32 -1.442695, %v2145_v5  ;;  %v2001_v21 = vadd.f32 %v2000_v27, %v4850_v42  ;;  %v2002_v7 = vpop.f32.mrb[23].mxu1  ;;  %v3557_v17 = vpop.eup %3556  ;;  %3576 = vpow2.f32 %v3113_v46  ;;  %v2346_v50 = vadd.f32 1.0, %v3555_v19 }
 0x2b0   : > { %v3115_v63 = vmul.f32 -1.442695, %v2146_v2  ;;  %v2003_v13 = vadd.f32 %v2002_v7, %v4850_v42  ;;  %v4876_v14 = vpop.eup %3558  ;;  %v2347_v42 = vadd.f32 1.0, %v3557_v17 }
 0x2b1   : > { %v2147_v52 = vmax.f32 %v2001_v21, 0.0  ;;  %3578 = vpow2.f32 %v3114_v53  ;;  %v3561_v23 = vpop.eup %3560  ;;  %v4892_v21 = vpop.permute.xlu1 %1699 }
 0x2b2   : > { %v2148_v6 = vmax.f32 %v2003_v13, 0.0  ;;  %v2006_v62 = vpop.f32.mrb[24].mxu1  ;;  %3580 = vpow2.f32 %v3115_v63  ;;  %v4879_v49 = vpop.eup %3562  ;;  %v2348_v41 = vadd.f32 1.0, %v3561_v23 }
 0x2b3   : > { %v3116_v26 = vmul.f32 -1.442695, %v2147_v52  ;;  %v2007_v3 = vadd.f32 %v2006_v62, %v4852_v8  ;;  %v2008_v37 = vpop.f32.mrb[25].mxu1  ;;  %3582 = vrcp.f32 %v2344_v44  ;;  %v3565_v56 = vpop.eup %3564 }
 0x2b4   : > { %v2009_v39 = vadd.f32 %v2008_v37, %v4852_v8  ;;  %3584 = vrcp.f32 %v2345_v16  ;;  %v3117_v30 = vmul.f32 -1.442695, %v2148_v6  ;;  %v3567_v45 = vpop.eup %3566  ;;  %v2349_v18 = vadd.f32 1.0, %v3565_v56  ;;  %v4894_v6 = vpop.permute.xlu0 %1734 }
 0x2b5   : > { %v2149_v51 = vmax.f32 %v2007_v3, 0.0  ;;  %3586 = vpow2.f32 %v3116_v26  ;;  %v4884_v11 = vpop.eup %3568  ;;  %v2350_v8 = vadd.f32 1.0, %v3567_v45 }
 0x2b6   : > { %v2150_v22 = vmax.f32 %v2009_v39, 0.0  ;;  %v2012_v32 = vpop.f32.mrb[26].mxu1  ;;  %5217 = vst [vmem:[#allocation9_spill] sm:$0xff] %v4884_v11  ;;  %3588 = vrcp.f32 %v2346_v50  ;;  %v4887_v46 = vpop.eup %3570 }
 0x2b7   : > { %v2013_v24 = vadd.f32 %v2012_v32, %v4854_v1  ;;  %v2014_v0 = vpop.f32.mrb[27].mxu1  ;;  %5218 = vst [vmem:[#allocation10_spill] sm:$0xff] %v4887_v46  ;;  %3590 = vrcp.f32 %v2347_v42  ;;  %v3573_v10 = vpop.eup %3572  ;;  %v3118_v2 = vmul.f32 -1.442695, %v2149_v51 }
 0x2b8   : > { %v2015_v5 = vadd.f32 %v2014_v0, %v4854_v1  ;;  %3592 = vpow2.f32 %v3117_v30  ;;  %v4890_v53 = vpop.eup %3574  ;;  %v3119_v7 = vmul.f32 -1.442695, %v2150_v22  ;;  %v2351_v13 = vadd.f32 1.0, %v3573_v10  ;;  %v4900_v22 = vpop.permute.xlu1 %1739 }
 0x2b9   : > { %v2151_v27 = vmax.f32 %v2013_v24, 0.0  ;;  %5219 = vst [vmem:[#allocation11_spill] sm:$0xff] %v4890_v53  ;;  %3594 = vrcp.f32 %v2348_v41  ;;  %v3577_v63 = vpop.eup %3576 }
 0x2ba   : > { %v2152_v19 = vmax.f32 %v2015_v5, 0.0  ;;  %v2018_v44 = vpop.f32.mrb[28].mxu1  ;;  %3596 = vrcp.f32 %v2349_v18  ;;  %v2352_v37 = vadd.f32 1.0, %v3577_v63  ;;  %v1705_v5 = vpop.permute.xlu0 %1704 }
 0x2bb   : > { %v2019_v17 = vadd.f32 %v2018_v44, %v1685_v38  ;;  %v2020_v16 = vpop.f32.mrb[29].mxu1  ;;  %v3579_v52 = vpop.eup %3578  ;;  %3598 = vrcp.f32 %v2350_v8  ;;  %v3120_v1 = vmul.f32 -1.442695, %v2151_v27 }
 0x2bc   : > { %v2021_v62 = vadd.f32 %v2020_v16, %v1685_v38  ;;  %v3581_v23 = vpop.eup %3580  ;;  %3600 = vpow2.f32 %v3118_v2  ;;  %v3121_v50 = vmul.f32 -1.442695, %v2152_v19  ;;  %v2353_v56 = vadd.f32 1.0, %v3579_v52 }
 0x2bd   : > { %v2153_v26 = vmax.f32 %v2019_v17, 0.0  ;;  %v4896_v3 = vpop.eup %3582  ;;  %3602 = vpow2.f32 %v3119_v7  ;;  %v2354_v38 = vadd.f32 1.0, %v3581_v23  ;;  %v1710_v23 = vpop.permute.xlu1 %1709 }
 0x2be   : > { %5220 = vst [vmem:[#allocation12_spill] sm:$0xff] %v4896_v3  ;;  %v2024_v42 = vpop.f32.mrb[30].mxu1  ;;  %v4898_v39 = vpop.eup %3584  ;;  %3604 = vrcp.f32 %v2351_v13  ;;  %v2154_v30 = vmax.f32 %v2021_v62, 0.0 }
 0x2bf   : > { %5221 = vst [vmem:[#allocation13_spill] sm:$0xff] %v4898_v39  ;;  %v2025_v51 = vadd.f32 %v2024_v42, %v1690_v58  ;;  %v2026_v45 = vpop.f32.mrb[31].mxu1  ;;  %v3587_v41 = vpop.eup %3586  ;;  %3606 = vpow2.f32 %v3120_v1  ;;  %v3122_v24 = vmul.f32 -1.442695, %v2153_v26 }
 0x2c0   : > { %v2027_v32 = vadd.f32 %v2026_v45, %v1690_v58  ;;  %v4902_v18 = vpop.eup %3588  ;;  %3608 = vpow2.f32 %v3121_v50  ;;  %v2355_v10 = vadd.f32 1.0, %v3587_v41  ;;  %v3123_v19 = vmul.f32 -1.442695, %v2154_v30 }
 0x2c1   : > { %5222 = vst [vmem:[#allocation14_spill] sm:$0xff] %v4902_v18  ;;  %v2155_v0 = vmax.f32 %v2025_v51, 0.0  ;;  %v4904_v8 = vpop.eup %3590  ;;  %3610 = vrcp.f32 %v2352_v37 }
 0x2c2   : > { %5223 = vst [vmem:[#allocation15_spill] sm:$0xff] %v4904_v8  ;;  %v2156_v2 = vmax.f32 %v2027_v32, 0.0  ;;  %v2030_v27 = vpop.f32.mrb[32].mxu1  ;;  %v3593_v7 = vpop.eup %3592  ;;  %3612 = vrcp.f32 %v2353_v56 }
 0x2c3   : > { %v2031_v44 = vadd.f32 %v2030_v27, %v4882_v15  ;;  %v2032_v63 = vpop.f32.mrb[33].mxu1  ;;  %v4907_v13 = vpop.eup %3594  ;;  %3614 = vrcp.f32 %v2354_v38  ;;  %v3124_v58 = vmul.f32 -1.442695, %v2155_v0  ;;  %v2356_v50 = vadd.f32 1.0, %v3593_v7 }
 0x2c4   : > { %5224 = vst [vmem:[#allocation16_spill] sm:$0xff] %v4907_v13  ;;  %v2033_v17 = vadd.f32 %v2032_v63, %v4882_v15  ;;  %v4910_v16 = vpop.eup %3596  ;;  %3616 = vpow2.f32 %v3122_v24  ;;  %v3125_v52 = vmul.f32 -1.442695, %v2156_v2  ;;  %v4915_v15 = vpop.permute.xlu0 %1744 }
 0x2c5   : > { %v2157_v1 = vmax.f32 %v2031_v44, 0.0  ;;  %v4912_v62 = vpop.eup %3598  ;;  %3618 = vrcp.f32 %v2355_v10 }
 0x2c6   : > { %v2158_v26 = vmax.f32 %v2033_v17, 0.0  ;;  %v2036_v37 = vpop.f32.mrb[34].mxu1  ;;  %v3601_v42 = vpop.eup %3600  ;;  %3620 = vpow2.f32 %v3123_v19 }
 0x2c7   : > { %v3126_v56 = vmul.f32 -1.442695, %v2157_v1  ;;  %v2037_v30 = vadd.f32 %v2036_v37, %v4892_v21  ;;  %v2038_v51 = vpop.f32.mrb[35].mxu1  ;;  %v3603_v45 = vpop.eup %3602  ;;  %3622 = vpow2.f32 %v3124_v58  ;;  %v2357_v10 = vadd.f32 1.0, %v3601_v42 }
 0x2c8   : > { %v3127_v41 = vmul.f32 -1.442695, %v2158_v26  ;;  %v2039_v38 = vadd.f32 %v2038_v51, %v4892_v21  ;;  %v4918_v32 = vpop.eup %3604  ;;  %3624 = vpow2.f32 %v3125_v52  ;;  %v2358_v19 = vadd.f32 1.0, %v3603_v45  ;;  %v4922_v58 = vpop.permute.xlu1 %1749 }
 0x2c9   : > { %v2159_v24 = vmax.f32 %v2037_v30, 0.0  ;;  %v3607_v0 = vpop.eup %3606  ;;  %3626 = vrcp.f32 %v2356_v50  ;;  %v1715_v30 = vpop.permute.xlu0 %1714 }
 0x2ca   : > { %v2160_v2 = vmax.f32 %v2039_v38, 0.0  ;;  %v2042_v27 = vpop.f32.mrb[36].mxu1  ;;  %v3609_v7 = vpop.eup %3608  ;;  %3628 = vpow2.f32 %v3126_v56  ;;  %v2359_v37 = vadd.f32 1.0, %v3607_v0 }
 0x2cb   : > { %v3128_v44 = vmul.f32 -1.442695, %v2159_v24  ;;  %v2043_v63 = vadd.f32 %v2042_v27, %v1705_v5  ;;  %v2044_v17 = vpop.f32.mrb[37].mxu1  ;;  %v4920_v1 = vpop.eup %3610  ;;  %3630 = vpow2.f32 %v3127_v41  ;;  %v2360_v56 = vadd.f32 1.0, %v3609_v7 }
 0x2cc   : > { %v3129_v21 = vmul.f32 -1.442695, %v2160_v2  ;;  %v2045_v26 = vadd.f32 %v2044_v17, %v1705_v5  ;;  %v4924_v52 = vpop.eup %3612  ;;  %v1720_v17 = vpop.permute.xlu1 %1719 }
 0x2cd   : > { %3632 = vpow2.f32 %v3128_v44  ;;  %v2161_v50 = vmax.f32 %v2043_v63, 0.0  ;;  %v4926_v42 = vpop.eup %3614  ;;  %v4932_v18 = vpop.permute.xlu0 %1754 }
 0x2ce   : > { %3634 = vrcp.f32 %v2357_v10  ;;  %v2162_v51 = vmax.f32 %v2045_v26, 0.0  ;;  %v2048_v45 = vpop.f32.mrb[38].mxu1  ;;  %v3617_v38 = vpop.eup %3616 }
 0x2cf   : > { %3636 = vrcp.f32 %v2358_v19  ;;  %v3130_v24 = vmul.f32 -1.442695, %v2161_v50  ;;  %v2049_v27 = vadd.f32 %v2048_v45, %v1710_v23  ;;  %v2050_v13 = vpop.f32.mrb[39].mxu1  ;;  %v4928_v41 = vpop.eup %3618  ;;  %v2361_v10 = vadd.f32 1.0, %v3617_v38 }
 0x2d0   : > { %3638 = vpow2.f32 %v3129_v21  ;;  %v3131_v5 = vmul.f32 -1.442695, %v2162_v51  ;;  %v2051_v2 = vadd.f32 %v2050_v13, %v1710_v23  ;;  %v3621_v0 = vpop.eup %3620 }
 0x2d1   : > { %3640 = vrcp.f32 %v2359_v37  ;;  %v2163_v44 = vmax.f32 %v2049_v27, 0.0  ;;  %v3623_v63 = vpop.eup %3622  ;;  %v2362_v21 = vadd.f32 1.0, %v3621_v0  ;;  %v4936_v0 = vpop.permute.xlu1 %1759 }
 0x2d2   : > { %3642 = vrcp.f32 %v2360_v56  ;;  %v2164_v7 = vmax.f32 %v2051_v2, 0.0  ;;  %v2054_v26 = vpop.f32.mrb[40].mxu1  ;;  %v3625_v31 = vpop.eup %3624  ;;  %v2363_v51 = vadd.f32 1.0, %v3623_v63 }
 0x2d3   : > { %3644 = vpow2.f32 %v3130_v24  ;;  %v3132_v19 = vmul.f32 -1.442695, %v2163_v44  ;;  %v2055_v50 = vadd.f32 %v2054_v26, %v1715_v30  ;;  %v2056_v45 = vpop.f32.mrb[41].mxu1  ;;  %v4930_v8 = vpop.eup %3626  ;;  %v2364_v27 = vadd.f32 1.0, %v3625_v31 }
 0x2d4   : > { %3646 = vpow2.f32 %v3131_v5  ;;  %v3133_v13 = vmul.f32 -1.442695, %v2164_v7  ;;  %v2057_v23 = vadd.f32 %v2056_v45, %v1715_v30  ;;  %v3629_v37 = vpop.eup %3628 }
 0x2d5   : > { %3648 = vpow2.f32 %v3132_v19  ;;  %v2165_v56 = vmax.f32 %v2055_v50, 0.0  ;;  %v3631_v38 = vpop.eup %3630  ;;  %v2365_v44 = vadd.f32 1.0, %v3629_v37  ;;  %v1725_v19 = vpop.permute.xlu0 %1724 }
 0x2d6   : > { %3650 = vrcp.f32 %v2361_v10  ;;  %v2060_v2 = vpop.f32.mrb[42].mxu1  ;;  %v2166_v26 = vmax.f32 %v2057_v23, 0.0  ;;  %v2366_v7 = vadd.f32 1.0, %v3631_v38 }
 0x2d7   : > { %v3633_v24 = vpop.eup %3632  ;;  %3652 = vpow2.f32 %v3133_v13  ;;  %v2061_v39 = vadd.f32 %v2060_v2, %v1720_v17  ;;  %v2062_v3 = vpop.f32.mrb[43].mxu1  ;;  %v3134_v30 = vmul.f32 -1.442695, %v2165_v56 }
 0x2d8   : > { %v4934_v53 = vpop.eup %3634  ;;  %3654 = vrcp.f32 %v2362_v21  ;;  %v2063_v5 = vadd.f32 %v2062_v3, %v1720_v17  ;;  %v2367_v50 = vadd.f32 1.0, %v3633_v24  ;;  %v3135_v37 = vmul.f32 -1.442695, %v2166_v26 }
 0x2d9   : > { %v4938_v63 = vpop.eup %3636  ;;  %3656 = vrcp.f32 %v2363_v51  ;;  %v2167_v10 = vmax.f32 %v2061_v39, 0.0 }
 0x2da   : > { %v3639_v31 = vpop.eup %3638  ;;  %3658 = vrcp.f32 %v2364_v27  ;;  %v2168_v45 = vmax.f32 %v2063_v5, 0.0  ;;  %v2066_v13 = vpop.f32.mrb[44].mxu1 }
 0x2db   : > { %v4940_v23 = vpop.eup %3640  ;;  %3660 = vrcp.f32 %v2365_v44  ;;  %v2067_v2 = vadd.f32 %v2066_v13, %v1725_v19  ;;  %v2068_v46 = vpop.f32.mrb[45].mxu1  ;;  %v2368_v3 = vadd.f32 1.0, %v3639_v31  ;;  %v3136_v39 = vmul.f32 -1.442695, %v2167_v10 }
 0x2dc   : > { %v4942_v21 = vpop.eup %3642  ;;  %3662 = vpow2.f32 %v3134_v30  ;;  %v2069_v17 = vadd.f32 %v2068_v46, %v1725_v19  ;;  %v1730_v27 = vpop.permute.xlu1 %1729  ;;  %v3137_v24 = vmul.f32 -1.442695, %v2168_v45 }
 0x2dd   : > { %v3645_v51 = vpop.eup %3644  ;;  %3664 = vrcp.f32 %v2366_v7  ;;  %v2169_v56 = vmax.f32 %v2067_v2, 0.0 }
 0x2de   : > { %v3647_v38 = vpop.eup %3646  ;;  %3666 = vrcp.f32 %v2367_v50  ;;  %v2072_v5 = vpop.f32.mrb[46].mxu1  ;;  %v2369_v31 = vadd.f32 1.0, %v3645_v51  ;;  %v2170_v30 = vmax.f32 %v2069_v17, 0.0 }
 0x2df   : > { %v3649_v47 = vpop.eup %3648  ;;  %3668 = vpow2.f32 %v3135_v37  ;;  %v3138_v44 = vmul.f32 -1.442695, %v2169_v56  ;;  %v2073_v26 = vadd.f32 %v2072_v5, %v1730_v27  ;;  %v2074_v13 = vpop.f32.mrb[47].mxu1  ;;  %v2370_v7 = vadd.f32 1.0, %v3647_v38 }
 0x2e0   : > { %v4944_v11 = vpop.eup %3650  ;;  %3670 = vrcp.f32 %v2368_v3  ;;  %v2075_v46 = vadd.f32 %v2074_v13, %v1730_v27  ;;  %v2371_v50 = vadd.f32 1.0, %v3649_v47  ;;  %v3139_v17 = vmul.f32 -1.442695, %v2170_v30 }
 0x2e1   : > { %v3653_v19 = vpop.eup %3652  ;;  %3672 = vpow2.f32 %v3136_v39  ;;  %v2171_v10 = vmax.f32 %v2073_v26, 0.0 }
 0x2e2   : > { %v4946_v2 = vpop.eup %3654  ;;  %3674 = vpow2.f32 %v3137_v24  ;;  %v2078_v45 = vpop.f32.mrb[48].mxu1  ;;  %v2372_v37 = vadd.f32 1.0, %v3653_v19  ;;  %v2172_v51 = vmax.f32 %v2075_v46, 0.0 }
 0x2e3   : > { %v4948_v29 = vpop.eup %3656  ;;  %3676 = vpow2.f32 %v3138_v44  ;;  %v2079_v56 = vadd.f32 %v2078_v45, %v4894_v6  ;;  %v2080_v5 = vpop.f32.mrb[49].mxu1  ;;  %v3140_v47 = vmul.f32 -1.442695, %v2171_v10 }
 0x2e4   : > { %v4951_v3 = vpop.eup %3658  ;;  %3678 = vrcp.f32 %v2369_v31  ;;  %v2081_v39 = vadd.f32 %v2080_v5, %v4894_v6  ;;  %v3141_v30 = vmul.f32 -1.442695, %v2172_v51 }
 0x2e5   : > { %5225 = vst [vmem:[#allocation17_spill] sm:$0xff] %v4951_v3  ;;  %v4954_v38 = vpop.eup %3660  ;;  %3680 = vrcp.f32 %v2370_v7  ;;  %v2173_v24 = vmax.f32 %v2079_v56, 0.0 }
 0x2e6   : > { %v3663_v27 = vpop.eup %3662  ;;  %3682 = vrcp.f32 %v2371_v50  ;;  %v2084_v26 = vpop.f32.mrb[50].mxu1  ;;  %v2174_v44 = vmax.f32 %v2081_v39, 0.0 }
 0x2e7   : > { %v4956_v13 = vpop.eup %3664  ;;  %3684 = vrcp.f32 %v2372_v37  ;;  %v2085_v19 = vadd.f32 %v2084_v26, %v4900_v22  ;;  %v2086_v45 = vpop.f32.mrb[51].mxu1  ;;  %v2373_v7 = vadd.f32 1.0, %v3663_v27 }
 0x2e8   : > { %v4959_v31 = vpop.eup %3666  ;;  %3686 = vpow2.f32 %v3139_v17  ;;  %v2087_v6 = vadd.f32 %v2086_v45, %v4900_v22  ;;  %v4968_v27 = vpop.permute.xlu0 %1764 }
 0x2e9   : > { %5226 = vst [vmem:[#allocation18_spill] sm:$0xff] %v4959_v31  ;;  %v3669_v46 = vpop.eup %3668  ;;  %3688 = vpow2.f32 %v3140_v47  ;;  %v2175_v50 = vmax.f32 %v2085_v19, 0.0 }
 0x2ea   : > { %v4962_v10 = vpop.eup %3670  ;;  %3690 = vtanh.f32 %v2173_v24  ;;  %v2090_v56 = vpop.f32.mrb[52].mxu1  ;;  %v2176_v37 = vmax.f32 %v2087_v6, 0.0  ;;  %v2374_v31 = vadd.f32 1.0, %v3669_v46 }
 0x2eb   : > { %v3673_v5 = vpop.eup %3672  ;;  %3692 = vtanh.f32 %v2174_v44  ;;  %v2091_v39 = vadd.f32 %v2090_v56, %v4915_v15  ;;  %v2092_v26 = vpop.f32.mrb[53].mxu1 }
 0x2ec   : > { %v3675_v3 = vpop.eup %3674  ;;  %3694 = vpow2.f32 %v3141_v30  ;;  %v2093_v51 = vadd.f32 %v2092_v26, %v4915_v15  ;;  %v2375_v24 = vadd.f32 1.0, %v3673_v5 }
 0x2ed   : > { %v3677_v17 = vpop.eup %3676  ;;  %3696 = vrcp.f32 %v2373_v7  ;;  %v2177_v22 = vmax.f32 %v2091_v39, 0.0  ;;  %v2376_v45 = vadd.f32 1.0, %v3675_v3  ;;  %v4975_v7 = vpop.permute.xlu1 %1769 }
 0x2ee   : > { %v4966_v47 = vpop.eup %3678  ;;  %3698 = vtanh.f32 %v2175_v50  ;;  %v2096_v19 = vpop.f32.mrb[54].mxu1  ;;  %v2377_v15 = vadd.f32 1.0, %v3677_v17  ;;  %v2178_v50 = vmax.f32 %v2093_v51, 0.0  ;;  %v2493_v51 = vmul.f32 %v4910_v16, %v4582_v25 }
 0x2ef   : > { %v4970_v44 = vpop.eup %3680  ;;  %3700 = vtanh.f32 %v2176_v37  ;;  %v2097_v6 = vadd.f32 %v2096_v19, %v4922_v58  ;;  %v2098_v46 = vpop.f32.mrb[55].mxu1 }
 0x2f0   : > { %5227 = vst [vmem:[#allocation19_spill] sm:$0xff] %v4970_v44  ;;  %v4973_v30 = vpop.eup %3682  ;;  %3702 = vrcp.f32 %v2374_v31  ;;  %v2099_v56 = vadd.f32 %v2098_v46, %v4922_v58  ;;  %v4985_v17 = vpop.permute.xlu0 %2583 }
 0x2f1   : > { %5228 = vst [vmem:[#allocation20_spill] sm:$0xff] %v4973_v30  ;;  %v4978_v39 = vpop.eup %3684  ;;  %3704 = vtanh.f32 %v2177_v22  ;;  %v2179_v3 = vmax.f32 %v2097_v6, 0.0 }
 0x2f2   : > { %5229 = vst [vmem:[#allocation21_spill] sm:$0xff] %v4978_v39  ;;  %v4980_v5 = vpop.eup %3686  ;;  %3706 = vrcp.f32 %v2375_v24  ;;  %v2102_v37 = vpop.f32.mrb[56].mxu1  ;;  %v2180_v19 = vmax.f32 %v2099_v56, 0.0  ;;  %v2494_v56 = vmul.f32 %v4912_v62, %v4586_v54  ;;  %v2495_v54 = vmul.f32 %v4918_v32, %v4595_v61 }
 0x2f3   : > { %v4982_v26 = vpop.eup %3688  ;;  %3708 = vrcp.f32 %v2376_v45  ;;  %v2103_v30 = vadd.f32 %v2102_v37, %v4932_v18  ;;  %v2104_v44 = vpop.f32.mrb[57].mxu1 }
 0x2f4   : > { %v3691_v31 = vpop.eup %3690  ;;  %3710 = vrcp.f32 %v2377_v15  ;;  %v2105_v58 = vadd.f32 %v2104_v44, %v4932_v18  ;;  %v4993_v45 = vpop.permute.xlu1 %2588 }
 0x2f5   : > { %v3693_v22 = vpop.eup %3692  ;;  %v2509_v24 = vmul.f32 %v3691_v31, %v4858_v34  ;;  %3712 = vtanh.f32 %v2178_v50  ;;  %v2181_v6 = vmax.f32 %v2103_v30, 0.0 }
 0x2f6   : > { %v4991_v46 = vpop.eup %3694  ;;  %v2510_v37 = vmul.f32 %v3693_v22, %v4861_v20  ;;  %3714 = vtanh.f32 %v2179_v3  ;;  %v2108_v15 = vpop.f32.mrb[58].mxu1  ;;  %v2182_v25 = vmax.f32 %v2105_v58, 0.0  ;;  %v2496_v58 = vmul.f32 %v4920_v1, %v4600_v4 }
 0x2f7   : > { %v4998_v18 = vpop.eup %3696  ;;  %v2525_v44 = vadd.f32 %v2509_v24, %v2493_v51  ;;  %3716 = vtanh.f32 %v2180_v19  ;;  %v2109_v34 = vadd.f32 %v2108_v15, %v4936_v0  ;;  %v2110_v16 = vpop.f32.mrb[59].mxu1  ;;  %v2497_v22 = vmul.f32 %v4924_v52, %v4609_v59 }
 0x2f8   : > { %v3699_v30 = vpop.eup %3698  ;;  %v2526_v50 = vadd.f32 %v2510_v37, %v2494_v56  ;;  %3718 = vtanh.f32 %v2181_v6  ;;  %v2111_v31 = vadd.f32 %v2110_v16, %v4936_v0  ;;  %v5007_v19 = vpop.permute.xlu0 %2647  ;;  %v2499_v52 = vmul.f32 %v4928_v41, %v4621_v33 }
 0x2f9   : > { %v3701_v39 = vpop.eup %3700  ;;  %3720 = vtanh.f32 %v2525_v44  ;;  %v2511_v20 = vmul.f32 %v3699_v30, %v4864_v9  ;;  %v2183_v62 = vmax.f32 %v2109_v34, 0.0  ;;  %v5017_v37 = vpop.permute.xlu1 %2652  ;;  %v2501_v30 = vmul.f32 %v4934_v53, %v4631_v36 }
 0x2fa   : > { %v5005_v3 = vpop.eup %3702  ;;  %3722 = vtanh.f32 %v2526_v50  ;;  %v2512_v0 = vmul.f32 %v3701_v39, %v4866_v12  ;;  %v2114_v51 = vpop.f32.mrb[60].mxu1  ;;  %v2184_v32 = vmax.f32 %v2111_v31, 0.0  ;;  %v2498_v12 = vmul.f32 %v4926_v42, %v4616_v57 }
 0x2fb   : > { %v3705_v24 = vpop.eup %3704  ;;  %v2527_v61 = vadd.f32 %v2511_v20, %v2495_v54  ;;  %3724 = vtanh.f32 %v2182_v25  ;;  %v2115_v9 = vadd.f32 %v2114_v51, %v4968_v27  ;;  %v2116_v6 = vpop.f32.mrb[61].mxu1  ;;  %v2500_v25 = vmul.f32 %v4930_v8, %v4626_v28 }
 0x2fc   : > { %v5015_v56 = vpop.eup %3706  ;;  %v2528_v15 = vadd.f32 %v2512_v0, %v2496_v58  ;;  %v2513_v4 = vmul.f32 %v3705_v24, %v4869_v60  ;;  %3726 = vtanh.f32 %v2183_v62  ;;  %v2117_v59 = vadd.f32 %v2116_v6, %v4968_v27  ;;  %v5036_v50 = vpop.permute.xlu0 %2593  ;;  %v5230_v62 = vld [vmem:[#allocation6_spill] sm:$0xff] }
 0x2fd   : > { %v5021_v1 = vpop.eup %3708  ;;  %3728 = vtanh.f32 %v2527_v61  ;;  %v2185_v39 = vmax.f32 %v2115_v9, 0.0  ;;  %v2502_v57 = vmul.f32 %v4938_v63, %v4635_v40  ;;  %v2503_v28 = vmul.f32 %v4940_v23, %v4642_v43  ;;  %v5047_v20 = vpop.permute.xlu1 %2598  ;;  %v5232_v9 = vld [vmem:[#allocation7_spill] sm:$0xff] }
 0x2fe   : > { %v5027_v44 = vpop.eup %3710  ;;  %3730 = vtanh.f32 %v2528_v15  ;;  %v2529_v60 = vadd.f32 %v2513_v4, %v2497_v22  ;;  %v2186_v34 = vmax.f32 %v2117_v59, 0.0  ;;  %v2120_v16 = vpop.f32.mrb[62].mxu1  ;;  %v5044_v36 = vmul.f32 %v4942_v21, %v4645_v35  ;;  %v5233_v15 = vld [vmem:[#allocation10_spill] sm:$0xff] }
 0x2ff   : > { %v3713_v27 = vpop.eup %3712  ;;  %3732 = vtanh.f32 %v2184_v32  ;;  %v2121_v33 = vadd.f32 %v2120_v16, %v4975_v7  ;;  %v2122_v42 = vpop.f32.mrb[63].mxu1  ;;  %v5051_v43 = vmul.f32 %v4944_v11, %v4654_v55  ;;  %v5056_v35 = vmul.f32 %v4946_v2, %v5230_v62  ;;  %v5235_v16 = vld [vmem:[#allocation18_spill] sm:$0xff]  ;;  %v5237_v62 = vld [vmem:[#allocation13_spill] sm:$0xff] }
 0x300   : > { %v3715_v41 = vpop.eup %3714  ;;  %3734 = vtanh.f32 %v2529_v60  ;;  %v2514_v8 = vmul.f32 %v3713_v27, %v4872_v48  ;;  %v2123_v31 = vadd.f32 %v2122_v42, %v4975_v7  ;;  %v2378_v2 = vadd.f32 1.0, %v4980_v5  ;;  %v5068_v32 = vpop.permute.xlu0 %2657  ;;  %v5234_v5 = vld [vmem:[#allocation11_spill] sm:$0xff] }
 0x301   : > { %v3717_v54 = vpop.eup %3716  ;;  %v2515_v40 = vmul.f32 %v3715_v41, %v4876_v14  ;;  %3736 = vtanh.f32 %v2185_v39  ;;  %v2187_v53 = vmax.f32 %v2121_v33, 0.0  ;;  %v5231_v14 = vld [vmem:[#allocation9_spill] sm:$0xff]  ;;  %v2507_v6 = vmul.f32 %v4948_v29, %v5232_v9  ;;  %v5078_v60 = vpop.permute.xlu1 %2662  ;;  %v2702_v29 = vld [vmem:[%s5063_s15 + $0x8] sm:$0xff] }
 0x302   : > { %v3719_v63 = vpop.eup %3718  ;;  %v2530_v48 = vadd.f32 %v2514_v8, %v2498_v12  ;;  %v2516_v23 = vmul.f32 %v3717_v54, %v4879_v49  ;;  %3738 = vtanh.f32 %v2186_v34  ;;  %v2188_v11 = vmax.f32 %v2123_v31, 0.0  ;;  %v2701_v39 = vld [vmem:[%s5063_s15] sm:$0xff]  ;;  %v5236_v8 = vld [vmem:[#allocation12_spill] sm:$0xff] }
 0x303   : > { %v3721_v7 = vpop.eup %3720  ;;  %v2531_v21 = vadd.f32 %v2515_v40, %v2499_v52  ;;  %v2517_v58 = vmul.f32 %v3719_v63, %v5231_v14  ;;  %3740 = vtanh.f32 %v2187_v53  ;;  %v2379_v12 = vadd.f32 1.0, %v4982_v26  ;;  %v2704_v14 = vld [vmem:[%s5063_s15 + $0x18] sm:$0xff] }
 0x304   : > { %v3723_v22 = vpop.eup %3722  ;;  %3742 = vtanh.f32 %v2530_v48  ;;  %v2532_v55 = vadd.f32 %v2516_v23, %v2500_v25  ;;  %v2557_v49 = vmul.f32 %v3721_v7, %v4954_v38  ;;  %v2703_v48 = vld [vmem:[%s5063_s15 + $0x10] sm:$0xff] }
 0x305   : > { %v3725_v0 = vpop.eup %3724  ;;  %3744 = vtanh.f32 %v2531_v21  ;;  %v2533_v51 = vadd.f32 %v2517_v58, %v2501_v30  ;;  %v2558_v24 = vmul.f32 %v3723_v22, %v4956_v13 }
 0x306   : > { %v3727_v61 = vpop.eup %3726  ;;  %3746 = vtanh.f32 %v2532_v55  ;;  %v2518_v4 = vmul.f32 %v3725_v0, %v5233_v15  ;;  %v2621_v38 = vmul.f32 %v4985_v17, %v2557_v49  ;;  %v5100_v0 = vpop.permute.xlu1 %2608  ;;  %v5240_v15 = vld [vmem:[#allocation19_spill] sm:$0xff] }
 0x307   : > { %v3729_v59 = vpop.eup %3728  ;;  %3748 = vtanh.f32 %v2533_v51  ;;  %v2519_v52 = vmul.f32 %v3727_v61, %v5234_v5  ;;  %v2622_v13 = vmul.f32 %v4985_v17, %v2558_v24 }
 0x308   : > { %v3731_v25 = vpop.eup %3730  ;;  %v2534_v34 = vadd.f32 %v2518_v4, %v2502_v57  ;;  %3750 = vtanh.f32 %v2188_v11  ;;  %v2559_v27 = vmul.f32 %v3729_v59, %v5235_v16  ;;  %v2685_v30 = vadd.f32 %v5007_v19, %v2621_v38  ;;  %v2705_v38 = vld [vmem:[%s5063_s15 + $0x20] sm:$0xff] }
 0x309   : > { %v3733_v33 = vpop.eup %3732  ;;  %3752 = vrcp.f32 %v2378_v2  ;;  %v2535_v26 = vadd.f32 %v2519_v52, %v2503_v28  ;;  %v2560_v42 = vmul.f32 %v3731_v25, %v4962_v10  ;;  %v2686_v41 = vadd.f32 %v5007_v19, %v2622_v13  ;;  %v5090_v10 = vpop.permute.xlu0 %2603  ;;  %v5241_v52 = vld [vmem:[#allocation20_spill] sm:$0xff]  ;;  %v5242_v25 = vld [vmem:[#allocation21_spill] sm:$0xff] }
 0x30a   : > { %v3735_v17 = vpop.eup %3734  ;;  %3754 = vtanh.f32 %v2534_v34  ;;  %v2520_v31 = vmul.f32 %v3733_v33, %v5236_v8  ;;  %v2623_v57 = vmul.f32 %v4993_v45, %v2559_v27  ;;  %v2717_v54 = vadd.f32 %v2701_v39, %v2685_v30  ;;  %v2706_v27 = vld [vmem:[%s5063_s15 + $0x28] sm:$0xff]  ;;  %v5245_v8 = vld [vmem:[#allocation16_spill] sm:$0xff] }
 0x30b   : > { %v3737_v40 = vpop.eup %3736  ;;  %3756 = vtanh.f32 %v2535_v26  ;;  %v2624_v53 = vmul.f32 %v4993_v45, %v2560_v42  ;;  %v2718_v63 = vadd.f32 %v2702_v29, %v2686_v41  ;;  %v2561_v28 = vmul.f32 %v3735_v17, %v4966_v47  ;;  %v5238_v45 = vld [vmem:[#allocation14_spill] sm:$0xff]  ;;  %v5243_v42 = vld [vmem:[#allocation8_spill] sm:$0xff]  ;;  %v5244_v41 = vld [vmem:[#allocation17_spill] sm:$0xff] }
 0x30c   : > { %v3739_v23 = vpop.eup %3738  ;;  %v2380_v19 = vadd.f32 1.0, %v4991_v46  ;;  %v2536_v7 = vadd.f32 %v2520_v31, %v5044_v36  ;;  %v2521_v21 = vmul.f32 %v3737_v40, %v5237_v62  ;;  %v2687_v58 = vadd.f32 %v5017_v37, %v2623_v57  ;;  %v5239_v36 = vld [vmem:[#allocation15_spill] sm:$0xff] }
 0x30d   : > { %v3741_v22 = vpop.eup %3740  ;;  %3758 = vrcp.f32 %v2379_v12  ;;  %v2522_v55 = vmul.f32 %v3739_v23, %v5238_v45  ;;  %v2688_v11 = vadd.f32 %v5017_v37, %v2624_v53  ;;  %v2625_v47 = vmul.f32 %v5036_v50, %v2561_v28  ;;  %v2668_v16 = vpop.permute.xlu0 %2667 }
 0x30e   : > { %v3743_v49 = vpop.eup %3742  ;;  %3760 = vtanh.f32 %v2536_v7  ;;  %v2537_v46 = vadd.f32 %v2521_v21, %v5051_v43  ;;  %v2523_v2 = vmul.f32 %v3741_v22, %v5239_v36  ;;  %v2719_v51 = vadd.f32 %v2703_v48, %v2687_v58  ;;  %v2673_v53 = vpop.permute.xlu1 %2672 }
 0x30f   : > { %v3745_v24 = vpop.eup %3744  ;;  %v2538_v61 = vadd.f32 %v2522_v55, %v5056_v35  ;;  %v2720_v9 = vadd.f32 %v2704_v14, %v2688_v11  ;;  %v2562_v4 = vmul.f32 %v3743_v49, %v5240_v15  ;;  %v2689_v37 = vadd.f32 %v5068_v32, %v2625_v47 }
 0x310   : > { %v3747_v59 = vpop.eup %3746  ;;  %3762 = vtanh.f32 %v2537_v46  ;;  %v2539_v12 = vadd.f32 %v2523_v2, %v2507_v6  ;;  %v3186_v5 = vpack.c.bf16 %v2719_v51, %v2717_v54  ;;  %v2563_v13 = vmul.f32 %v3745_v24, %v5241_v52  ;;  %v2707_v54 = vld [vmem:[%s5063_s15 + $0x30] sm:$0xff]  ;;  %v2710_v46 = vld [vmem:[%s5063_s15 + $0x48] sm:$0xff] }
 0x311   : > { %v3749_v43 = vpop.eup %3748  ;;  %3764 = vtanh.f32 %v2538_v61  ;;  %v3184_v39 = vpack.c.bf16 %v2720_v9, %v2718_v63  ;;  %v2564_v34 = vmul.f32 %v3747_v59, %v5242_v25  ;;  %v2626_v35 = vmul.f32 %v5036_v50, %v2562_v4  ;;  %v2708_v63 = vld [vmem:[%s5063_s15 + $0x38] sm:$0xff]  ;;  %v2614_v47 = vpop.permute.xlu0 %2613  ;;  %v2711_v51 = vld [vmem:[%s5063_s15 + $0x50] sm:$0xff]  ;;  %v2713_v25 = vld [vmem:[%s5063_s15 + $0x60] sm:$0xff] }
 0x312   : > { %v3751_v29 = vpop.eup %3750  ;;  %3766 = vtanh.f32 %v2539_v12  ;;  %v2627_v30 = vmul.f32 %v5047_v20, %v2563_v13  ;;  %v2721_v33 = vadd.f32 %v2705_v38, %v2689_v37  ;;  %v2565_v6 = vmul.f32 %v3749_v43, %v4998_v18  ;;  %v2619_v24 = vpop.permute.xlu1 %2618  ;;  %v2712_v38 = vld [vmem:[%s5063_s15 + $0x58] sm:$0xff] }
 0x313   : > { %v3753_v26 = vpop.eup %3752  ;;  %v2508_v17 = vmul.f32 %v5244_v41, %v5243_v42  ;;  %v2524_v31 = vmul.f32 %v3751_v29, %v5245_v8  ;;  %3185 = vmatprep.subr.bf16.mxu0 %v3184_v39  ;;  %v2628_v50 = vmul.f32 %v5047_v20, %v2564_v34  ;;  %v2690_v57 = vadd.f32 %v5068_v32, %v2626_v35  ;;  %v2709_v20 = vld [vmem:[%s5063_s15 + $0x40] sm:$0xff]  ;;  %v2714_v35 = vld [vmem:[%s5063_s15 + $0x68] sm:$0xff] }
 0x314   : > { %v3755_v40 = vpop.eup %3754  ;;  %3187 = vmatpush1.bf16.msra.mxu0 %v3186_v5  ;;  %v2691_v48 = vadd.f32 %v5078_v60, %v2627_v30  ;;  %v2629_v18 = vmul.f32 %v5090_v10, %v2565_v6  ;;  %3768 = vrcp.f32 %v2380_v19  ;;  %v2715_v30 = vld [vmem:[%s5063_s15 + $0x70] sm:$0xff] }
 0x315   : > { %v3757_v28 = vpop.eup %3756  ;;  %v2540_v23 = vadd.f32 %v2524_v31, %v2508_v17  ;;  %v2692_v7 = vadd.f32 %v5078_v60, %v2628_v50  ;;  %v2722_v62 = vadd.f32 %v2706_v27, %v2690_v57  ;;  %v2566_v21 = vmul.f32 %v3755_v40, %v5005_v3  ;;  %v2678_v13 = vpop.permute.xlu0 %2677  ;;  %v2716_v50 = vld [vmem:[%s5063_s15 + $0x78] sm:$0xff]  ;;  %s2842_s15 = scalar_lea.sflag [#allocation4], %s456_s16 }
 0x316   : > { %v2723_v32 = vadd.f32 %v2707_v54, %v2691_v48  ;;  %v2567_v14 = vmul.f32 %v3757_v28, %v5015_v56  ;;  %v2693_v58 = vadd.f32 %v2668_v16, %v2629_v18  ;;  %v2740_v48 = vlaneseq }
 0x317   : > { %v3759_v22 = vpop.eup %3758  ;;  %3770 = vtanh.f32 %v2540_v23  ;;  %v2724_v45 = vadd.f32 %v2708_v63, %v2692_v7  ;;  %v2630_v55 = vmul.f32 %v5090_v10, %v2566_v21  ;;  %v2733_v63 = vld [vmem:[%s5204_s9] sm:$0x1]  ;;  %v3854_v28 = vmov 1966171168  }
 0x318   : > { %v3761_v11 = vpop.eup %3760  ;;  %v3190_v49 = vpack.c.bf16 %v2723_v32, %v2721_v33  ;;  %v2631_v60 = vmul.f32 %v5100_v0, %v2567_v14  ;;  %v2725_v3 = vadd.f32 %v2709_v20, %v2693_v58  ;;  %v2741_v18 = vshrl.u32 %v2740_v48, 7 }
 0x319   : > { %v3188_v36 = vpack.c.bf16 %v2724_v45, %v2722_v62  ;;  %v2568_v19 = vmul.f32 %v3761_v11, %v5021_v1  ;;  %v2694_v2 = vadd.f32 %v2668_v16, %v2630_v55  ;;  %v2822_v23 = vunpack.c.l.s4 %v3854_v28  ;;  %v2738_v62 = vpop.permute.xlu0 %2737 }
 0x31a   : > { %v3763_v56 = vpop.eup %3762  ;;  %v2695_v61 = vadd.f32 %v2673_v53, %v2631_v60  ;;  %v2742_v7 = vsub.s32 0, %v2741_v18  ;;  %vm2838_vm1 = vcmp.lt.s32.totalorder %v2740_v48, 256 }
 0x31b   : > { %v3765_v9 = vpop.eup %3764  ;;  %3189 = vmatprep.subr.bf16.mxu0 %v3188_v36  ;;  %v2632_v10 = vmul.f32 %v5100_v0, %v2568_v19  ;;  %v2726_v15 = vadd.f32 %v2710_v46, %v2694_v2  ;;  %v2569_v4 = vmul.f32 %v3763_v56, %v5027_v44  ;;  %v2683_v44 = vpop.permute.xlu1 %2682  ;;  %v2823_v21 = vunpack.c.0.s8 %v2822_v23 }
 0x31c   : > { %v3767_v37 = vpop.eup %3766  ;;  %3191 = vmatpush1.bf16.msra.mxu0 %v3190_v49  ;;  %v2727_v59 = vadd.f32 %v2711_v51, %v2695_v61  ;;  %v2570_v1 = vmul.f32 %v3765_v9, %v3753_v26  ;;  %v2743_v20 = vrot.slane %v2738_v62, %v2742_v7 }
 0x31d   : > { %v2696_v12 = vadd.f32 %v2673_v53, %v2632_v10  ;;  %v2571_v5 = vmul.f32 %v3767_v37, %v3759_v22  ;;  %v2633_v52 = vmul.f32 %v2614_v47, %v2569_v4  ;;  %v2826_v45 = vsub.s32 %v2823_v21, %v2741_v18 }
 0x31e   : > { %v3194_v43 = vpack.c.bf16 %v2727_v59, %v2725_v3  ;;  %v2634_v39 = vmul.f32 %v2614_v47, %v2570_v1  ;;  %v3769_v16 = vpop.eup %3768 }
 0x31f   : > { %v2728_v34 = vadd.f32 %v2712_v38, %v2696_v12  ;;  %v2635_v0 = vmul.f32 %v2619_v24, %v2571_v5  ;;  %v2697_v29 = vadd.f32 %v2678_v13, %v2633_v52 }
 0x320   : > { %v2698_v27 = vadd.f32 %v2678_v13, %v2634_v39 }
 0x321   : > { %v3771_v33 = vpop.eup %3770  ;;  %v3192_v6 = vpack.c.bf16 %v2728_v34, %v2726_v15  ;;  %v2699_v42 = vadd.f32 %v2683_v44, %v2635_v0  ;;  %v2729_v26 = vadd.f32 %v2713_v25, %v2697_v29 }
 0x322   : > { %v2572_v41 = vmul.f32 %v3771_v33, %v3769_v16  ;;  %v2730_v17 = vadd.f32 %v2714_v35, %v2698_v27 }
 0x323   : > { %3193 = vmatprep.subr.bf16.mxu0 %v3192_v6  ;;  %v2731_v8 = vadd.f32 %v2715_v30, %v2699_v42 }
 0x324   : > { %3195 = vmatpush1.bf16.msra.mxu0 %v3194_v43  ;;  %v2636_v31 = vmul.f32 %v2619_v24, %v2572_v41 }
 0x325   : > { %v3198_v57 = vpack.c.bf16 %v2731_v8, %v2729_v26 }
 0x326   : > { %v2700_v54 = vadd.f32 %v2683_v44, %v2636_v31 }
 0x328   : > { %v2732_v40 = vadd.f32 %v2716_v50, %v2700_v54 }
 0x32a   : > { %v3196_v53 = vpack.c.bf16 %v2732_v40, %v2730_v17 }
 0x32c   : > { %3197 = vmatprep.subr.bf16.mxu0 %v3196_v53 }
 0x32d   : > { %3199 = vmatpush1.bf16.msra.mxu0 %v3198_v57 }
 0x330   : > { %3142 = vmatmul.mubr.msk.f32.vlgmr.msra.gmra.mrb[64].mxu0 %vm746_vm0, %v2733_v63 }
 0x403   : > { %v2813_v32 = vpop.f32.mrb[64].mxu0 }
 0x404   : > { %v2814_v14 = vadd.f32 %v2813_v32, %v2743_v20  ;;  %v2815_v58 = vpop.f32.mrb[65].mxu0 }
 0x405   : > { %v2816_v22 = vadd.f32 %v2815_v58, %v2743_v20 }
 0x407   : > { %v2820_v55 = vcombine.low %v2814_v14, %v2816_v22 }
 0x409   : > { %v2827_v11 = vrot.slane %v2820_v55, %v2826_v45 }
 0x40b   : > { %v2834_v47 = vrot.slane %v2827_v11, %v2826_v45 }
 0x40d   : > { %2840 = vst.msk [vmem:[%s458_s17] sm:$0x3] %vm2838_vm1, %v2834_v47 }
 0x40e   : > { %3785 = shalt.err (!%p3782_p5)
}
 0x40f   : > { %s3786_s16 = scalar_lea.hbm %s5148_s13, 32  ;;  %s3790_s25 = scalar_lea.hbm %s5206_s11, 64 }
 0x410   : > { %p3787_p6 = scmp.ne.s32.totalorder %s5148_s13, %s3786_s16  ;;  %p3791_p10 = scmp.lt.u32.totalorder %s5148_s13, %s5206_s11 }
 0x411   : > { %p3792_p11 = scmp.lt.u32.totalorder %s3790_s25, %s3786_s16  ;;  %p3794_p13 = scmp.lt.u32.totalorder %s3786_s16, %s5148_s13 }
 0x412   : > { %p3788_p7 = pnand %p3787_p6, %p3959_p4 }
 0x413   : > { %p3793_p12 = por %p3792_p11, %p3791_p10 }
 0x414   : > { %p3789_p9 = pneg %p3788_p7 }
 0x415   : > { %p3795_p0 = por %p3794_p13, %p3793_p12 }
 0x417   : > { %p3796_p1 = pnand %p3795_p0, %p3789_p9 }
 0x419   : > { %3799 = shalt.err (!%p3796_p1)
}
 0x41a   : > { %3200 = dma.vmem_to_hbm [thread:$0]  (%p3959_p4), %s5150_s10, 32, %s5148_s13, %s2842_s15  }
 0x41b PF: > { %p3206_p2 = scmp.ge.s32.totalorder %s3850_s24, 2  ;;  %s2870_s29 = sand.u32 1, %s3830_s19  }
 0x41c   : > { %s2871_s14 = scalar_lea.sflag [#allocation4], %s2870_s29 }
 0x41d   : > { %p3203_p3 = pnand %p3206_p2, %p3966_p8 }
 0x41f   : > { %3825 = dma.done.wait (!%p3203_p3), %s2871_s14, 32  }
 0x420   : > { %3827 = vsyncadd (!%p3203_p3), %s2871_s14, 4294967264  ;;  %s26_s24 = sadd.s32 1, %s3850_s24   ;;  %s5246_s19 = smov %s3834_s20 }
 0x421   : > { %p23_p5 = scmp.ge.s32.totalorder %s26_s24, 4   ;;  %s5247_s20 = smov %s3838_s21 }
 0x422   : > { %s5248_s21 = smov %s3972_s12  ;;  %s5249_s22 = smov %s3846_s23 }
 0x423   : > { %s5250_s23 = smov %s5252_s26  ;;  %25 = sbr.rel (!%p23_p5) target bundleno = 7 (0x7), region = 105 }
 0x42a   :  { %2876 = vsyncpa [#allocation4], 1 }
 0x42b   :  { %2878 = vsyncpa [#allocation4 + $0x1], 1 }

</bundles_post_ra>
